<compile_context>
chip_gen: v7x
topology: tpu7x:2x2x1
jax: 0.10.0
libtpu: 0.0.40
codegen_flags: <defaults>
</compile_context>

<pallas_src>
import functools

import jax
import jax.numpy as jnp
from jax.experimental import pallas as pl
from jax.experimental.pallas import tpu as pltpu

LANE = 128  # TPU lane width


def _round_up(x, m):
    return (x + m - 1) // m * m


def _conv_stats_kernel(x_ref, w_ref, yconv_ref, stats_ref, patches_ref, *,
                       Ho, Wo, Cin, KH, KW):
    """Per-image conv (single MXU matmul, K = KH*KW*Cin) + partial BN stats.

    x_ref:       (1, Hp, Wp, Cin)     bf16  padded input image
    w_ref:       (KH*KW*Cin, Cpad)    bf16  im2col weight matrix (lane padded)
    yconv_ref:   (1, Ho*Wo, Cpad)     f32   conv output (lane dense)
    stats_ref:   (1, 2, Cpad)         f32   per-image [sum, sumsq] per channel
    patches_ref: (Ho*Wo, KH*KW*Cin)   bf16  VMEM scratch: im2col patch matrix
    """
    x = x_ref[0]  # (Hp, Wp, Cin)

    # Build the im2col patch matrix once, in VMEM scratch (not a traced value
    # held across taps), so the whole conv is ONE matmul with K = KH*KW*Cin
    # instead of KH*KW tiny K=Cin matmuls.
    for kh in range(KH):
        for kw in range(KW):
            t = kh * KW + kw
            patch = x[kh:kh + Ho, kw:kw + Wo, :].reshape(Ho * Wo, Cin)
            patches_ref[:, t * Cin:(t + 1) * Cin] = patch

    # bf16 MXU matmul, f32 accumulation; Cpad (multiple of 128) output lanes.
    y = jnp.dot(patches_ref[...], w_ref[...],
                preferred_element_type=jnp.float32)       # (Ho*Wo, Cpad) f32

    # One-pass per-image BN partial statistics.
    stats_ref[0, 0:1, :] = jnp.sum(y, axis=0, keepdims=True)
    stats_ref[0, 1:2, :] = jnp.sum(y * y, axis=0, keepdims=True)

    yconv_ref[0] = y


def _bn_apply_kernel(y_ref, scale_ref, shift_ref, out_ref):
    """Apply precomputed per-channel affine: out = y * scale + shift."""
    out_ref[0] = y_ref[0] * scale_ref[...] + shift_ref[...]


def basic_conv2d(x_nchw, weight_oihw, gamma, beta, *, padding=1, eps=1e-5):
    N, Cin, H, W = x_nchw.shape
    Cout, _, KH, KW = weight_oihw.shape
    Ho = H + 2 * padding - KH + 1
    Wo = W + 2 * padding - KW + 1
    Hp, Wp = H + 2 * padding, W + 2 * padding
    Cpad = _round_up(max(Cout, LANE), LANE)
    K = KH * KW * Cin

    # ---- layout plumbing for the NCHW module interface --------------------
    x_nhwc = jnp.transpose(x_nchw, (0, 2, 3, 1))
    x_pad = jnp.pad(x_nhwc, ((0, 0), (padding, padding),
                             (padding, padding), (0, 0))).astype(jnp.bfloat16)
    # OIHW -> HWIO -> (KH*KW*Cin, Cout), lane-padded to Cpad.
    w2d = jnp.transpose(weight_oihw, (2, 3, 1, 0)).reshape(K, Cout)
    w2d = jnp.pad(w2d, ((0, 0), (0, Cpad - Cout))).astype(jnp.bfloat16)

    cparams = pltpu.CompilerParams(
        dimension_semantics=("parallel",),          # shard images across TCs
        vmem_limit_bytes=32 * 1024 * 1024)          # explicit (safe on v7x)

    # ---- phase 1: conv + per-image partial BN stats ------------------------
    conv_kernel = functools.partial(
        _conv_stats_kernel, Ho=Ho, Wo=Wo, Cin=Cin, KH=KH, KW=KW)

    y_conv, stats = pl.pallas_call(
        conv_kernel,
        grid=(N,),
        in_specs=(
            pl.BlockSpec((1, Hp, Wp, Cin), lambda n: (n, 0, 0, 0)),
            pl.BlockSpec(memory_space=pltpu.MemorySpace.VMEM),   # weights
        ),
        out_specs=(
            pl.BlockSpec((1, Ho * Wo, Cpad), lambda n: (n, 0, 0)),
            pl.BlockSpec((1, 2, Cpad), lambda n: (n, 0, 0)),
        ),
        out_shape=(
            jax.ShapeDtypeStruct((N, Ho * Wo, Cpad), jnp.float32),
            jax.ShapeDtypeStruct((N, 2, Cpad), jnp.float32),
        ),
        scratch_shapes=[pltpu.VMEM((Ho * Wo, K), jnp.bfloat16)],
        compiler_params=cparams,
    )(x_pad, w2d)

    # ---- global BN statistics (training mode), tiny finalize in JAX --------
    count = float(N * Ho * Wo)
    total_s = jnp.sum(stats[:, 0, :], axis=0)            # (Cpad,)
    total_ss = jnp.sum(stats[:, 1, :], axis=0)
    mean = total_s / count
    var = jnp.maximum(total_ss / count - mean * mean, 0.0)
    gamma_p = jnp.pad(gamma.astype(jnp.float32), (0, Cpad - Cout))
    beta_p = jnp.pad(beta.astype(jnp.float32), (0, Cpad - Cout))
    scale = gamma_p * jax.lax.rsqrt(var + eps)
    shift = beta_p - mean * scale
    scale_row = scale.reshape(1, Cpad)
    shift_row = shift.reshape(1, Cpad)

    # ---- phase 2: apply normalization (lane-dense elementwise) -------------
    y_bn = pl.pallas_call(
        _bn_apply_kernel,
        grid=(N,),
        in_specs=(
            pl.BlockSpec((1, Ho * Wo, Cpad), lambda n: (n, 0, 0)),
            pl.BlockSpec(memory_space=pltpu.MemorySpace.VMEM),
            pl.BlockSpec(memory_space=pltpu.MemorySpace.VMEM),
        ),
        out_specs=pl.BlockSpec((1, Ho * Wo, Cpad), lambda n: (n, 0, 0)),
        out_shape=jax.ShapeDtypeStruct((N, Ho * Wo, Cpad), jnp.float32),
        compiler_params=cparams,
    )(y_conv, scale_row, shift_row)

    out = y_bn[:, :, :Cout].reshape(N, Ho, Wo, Cout)
    return jnp.transpose(out, (0, 3, 1, 2))              # back to NCHW


def _reference(x, w, gamma, beta, padding, eps):
    """Pure-JAX reference: bf16-input conv (f32 accum) + training-mode BN."""
    y = jax.lax.conv_general_dilated(
        x.astype(jnp.bfloat16), w.astype(jnp.bfloat16),
        window_strides=(1, 1),
        padding=[(padding, padding), (padding, padding)],
        dimension_numbers=('NCHW', 'OIHW', 'NCHW'),
        preferred_element_type=jnp.float32)
    mean = jnp.mean(y, axis=(0, 2, 3), keepdims=True)
    var = jnp.mean((y - mean) ** 2, axis=(0, 2, 3), keepdims=True)
    g = gamma.reshape(1, -1, 1, 1).astype(jnp.float32)
    b = beta.reshape(1, -1, 1, 1).astype(jnp.float32)
    return (y - mean) * jax.lax.rsqrt(var + eps) * g + b


if __name__ == "__main__":
    # BasicConv2d(in_channels=4, out_channels=8, kernel_size=3, padding=1)
    # applied to a (2, 4, 16, 16) NCHW input.
    key = jax.random.PRNGKey(0)
    k_x, k_w = jax.random.split(key)

    N, Cin, H, W = 2, 4, 16, 16
    Cout, KH, KW = 8, 3, 3
    padding = 1
    eps = 1e-5

    x = jax.random.normal(k_x, (N, Cin, H, W), dtype=jnp.float32)
    weight = 0.1 * jax.random.normal(k_w, (Cout, Cin, KH, KW), dtype=jnp.float32)
    gamma = jnp.ones((Cout,), dtype=jnp.float32)
    beta = jnp.zeros((Cout,), dtype=jnp.float32)

    fn = jax.jit(basic_conv2d, static_argnames=("padding", "eps"))
    out = fn(x, weight, gamma, beta, padding=padding, eps=eps)
    out = jax.block_until_ready(out)

    ref = _reference(x, weight, gamma, beta, padding, eps)
    assert out.shape == (N, Cout, H, W), out.shape
    err = float(jnp.max(jnp.abs(out - ref)))
    assert jnp.allclose(out, ref, atol=1e-3, rtol=1e-3), err

    print("KERNEL_OK")
</pallas_src>

<mosaic_0001>
module attributes {stable_mosaic.version = 11 : i64} {
  func.func @_conv_stats_kernel(%arg0: i32, %arg1: memref<1x18x18x4xbf16, #tpu.memory_space<vmem>>, %arg2: memref<36x128xbf16, #tpu.memory_space<vmem>>, %arg3: memref<1x256x128xf32, #tpu.memory_space<vmem>>, %arg4: memref<1x2x128xf32, #tpu.memory_space<vmem>>, %arg5: memref<256x36xbf16, #tpu.memory_space<vmem>>) attributes {dimension_semantics = [#tpu.dimension_semantics<parallel>], iteration_bounds = array<i64: 2>, scalar_prefetch = 0 : i64, scratch_operands = 1 : i64, tpu.core_type = #tpu.core_type<tc>, window_params = [{transform_indices = @transform_0, window_bounds = array<i64: 1, 18, 18, 4>}, {pipeline_mode = #tpu.pipeline_mode<synchronous>, transform_indices = @transform_1, window_bounds = array<i64: 36, 128>}, {transform_indices = @transform_2, window_bounds = array<i64: 1, 256, 128>}, {transform_indices = @transform_3, window_bounds = array<i64: 1, 2, 128>}]} {
    %c0 = arith.constant 0 : index
    %c0_0 = arith.constant 0 : index
    %c0_1 = arith.constant 0 : index
    %c0_2 = arith.constant 0 : index
    %0 = vector.load %arg1[%c0, %c0_0, %c0_1, %c0_2] : memref<1x18x18x4xbf16, #tpu.memory_space<vmem>>, vector<1x18x18x4xbf16>
    %1 = vector.shape_cast %0 : vector<1x18x18x4xbf16> to vector<18x18x4xbf16>
    %2 = vector.extract_strided_slice %1 {offsets = [0, 0, 0], sizes = [16, 16, 4], strides = [1, 1, 1]} : vector<18x18x4xbf16> to vector<16x16x4xbf16>
    %3 = vector.shape_cast %2 : vector<16x16x4xbf16> to vector<256x4xbf16>
    %c0_3 = arith.constant 0 : index
    %c0_4 = arith.constant 0 : index
    %4 = vector.load %arg5[%c0_3, %c0_4] : memref<256x36xbf16, #tpu.memory_space<vmem>>, vector<256x4xbf16>
    tpu.vector_store %arg5[%c0_3, %c0_4], %3 {strides = array<i32>} : memref<256x36xbf16, #tpu.memory_space<vmem>>, vector<256x4xbf16>,
    %5 = vector.extract_strided_slice %1 {offsets = [0, 1, 0], sizes = [16, 16, 4], strides = [1, 1, 1]} : vector<18x18x4xbf16> to vector<16x16x4xbf16>
    %6 = vector.shape_cast %5 : vector<16x16x4xbf16> to vector<256x4xbf16>
    %c0_5 = arith.constant 0 : index
    %c4 = arith.constant 4 : index
    %7 = vector.load %arg5[%c0_5, %c4] : memref<256x36xbf16, #tpu.memory_space<vmem>>, vector<256x4xbf16>
    tpu.vector_store %arg5[%c0_5, %c4], %6 {strides = array<i32>} : memref<256x36xbf16, #tpu.memory_space<vmem>>, vector<256x4xbf16>,
    %8 = vector.extract_strided_slice %1 {offsets = [0, 2, 0], sizes = [16, 16, 4], strides = [1, 1, 1]} : vector<18x18x4xbf16> to vector<16x16x4xbf16>
    %9 = vector.shape_cast %8 : vector<16x16x4xbf16> to vector<256x4xbf16>
    %c0_6 = arith.constant 0 : index
    %c8 = arith.constant 8 : index
    %10 = vector.load %arg5[%c0_6, %c8] : memref<256x36xbf16, #tpu.memory_space<vmem>>, vector<256x4xbf16>
    tpu.vector_store %arg5[%c0_6, %c8], %9 {strides = array<i32>} : memref<256x36xbf16, #tpu.memory_space<vmem>>, vector<256x4xbf16>,
    %11 = vector.extract_strided_slice %1 {offsets = [1, 0, 0], sizes = [16, 16, 4], strides = [1, 1, 1]} : vector<18x18x4xbf16> to vector<16x16x4xbf16>
    %12 = vector.shape_cast %11 : vector<16x16x4xbf16> to vector<256x4xbf16>
    %c0_7 = arith.constant 0 : index
    %c12 = arith.constant 12 : index
    %13 = vector.load %arg5[%c0_7, %c12] : memref<256x36xbf16, #tpu.memory_space<vmem>>, vector<256x4xbf16>
    tpu.vector_store %arg5[%c0_7, %c12], %12 {strides = array<i32>} : memref<256x36xbf16, #tpu.memory_space<vmem>>, vector<256x4xbf16>,
    %14 = vector.extract_strided_slice %1 {offsets = [1, 1, 0], sizes = [16, 16, 4], strides = [1, 1, 1]} : vector<18x18x4xbf16> to vector<16x16x4xbf16>
    %15 = vector.shape_cast %14 : vector<16x16x4xbf16> to vector<256x4xbf16>
    %c0_8 = arith.constant 0 : index
    %c16 = arith.constant 16 : index
    %16 = vector.load %arg5[%c0_8, %c16] : memref<256x36xbf16, #tpu.memory_space<vmem>>, vector<256x4xbf16>
    tpu.vector_store %arg5[%c0_8, %c16], %15 {strides = array<i32>} : memref<256x36xbf16, #tpu.memory_space<vmem>>, vector<256x4xbf16>,
    %17 = vector.extract_strided_slice %1 {offsets = [1, 2, 0], sizes = [16, 16, 4], strides = [1, 1, 1]} : vector<18x18x4xbf16> to vector<16x16x4xbf16>
    %18 = vector.shape_cast %17 : vector<16x16x4xbf16> to vector<256x4xbf16>
    %c0_9 = arith.constant 0 : index
    %c20 = arith.constant 20 : index
    %19 = vector.load %arg5[%c0_9, %c20] : memref<256x36xbf16, #tpu.memory_space<vmem>>, vector<256x4xbf16>
    tpu.vector_store %arg5[%c0_9, %c20], %18 {strides = array<i32>} : memref<256x36xbf16, #tpu.memory_space<vmem>>, vector<256x4xbf16>,
    %20 = vector.extract_strided_slice %1 {offsets = [2, 0, 0], sizes = [16, 16, 4], strides = [1, 1, 1]} : vector<18x18x4xbf16> to vector<16x16x4xbf16>
    %21 = vector.shape_cast %20 : vector<16x16x4xbf16> to vector<256x4xbf16>
    %c0_10 = arith.constant 0 : index
    %c24 = arith.constant 24 : index
    %22 = vector.load %arg5[%c0_10, %c24] : memref<256x36xbf16, #tpu.memory_space<vmem>>, vector<256x4xbf16>
    tpu.vector_store %arg5[%c0_10, %c24], %21 {strides = array<i32>} : memref<256x36xbf16, #tpu.memory_space<vmem>>, vector<256x4xbf16>,
    %23 = vector.extract_strided_slice %1 {offsets = [2, 1, 0], sizes = [16, 16, 4], strides = [1, 1, 1]} : vector<18x18x4xbf16> to vector<16x16x4xbf16>
    %24 = vector.shape_cast %23 : vector<16x16x4xbf16> to vector<256x4xbf16>
    %c0_11 = arith.constant 0 : index
    %c28 = arith.constant 28 : index
    %25 = vector.load %arg5[%c0_11, %c28] : memref<256x36xbf16, #tpu.memory_space<vmem>>, vector<256x4xbf16>
    tpu.vector_store %arg5[%c0_11, %c28], %24 {strides = array<i32>} : memref<256x36xbf16, #tpu.memory_space<vmem>>, vector<256x4xbf16>,
    %26 = vector.extract_strided_slice %1 {offsets = [2, 2, 0], sizes = [16, 16, 4], strides = [1, 1, 1]} : vector<18x18x4xbf16> to vector<16x16x4xbf16>
    %27 = vector.shape_cast %26 : vector<16x16x4xbf16> to vector<256x4xbf16>
    %c0_12 = arith.constant 0 : index
    %c32 = arith.constant 32 : index
    %28 = vector.load %arg5[%c0_12, %c32] : memref<256x36xbf16, #tpu.memory_space<vmem>>, vector<256x4xbf16>
    tpu.vector_store %arg5[%c0_12, %c32], %27 {strides = array<i32>} : memref<256x36xbf16, #tpu.memory_space<vmem>>, vector<256x4xbf16>,
    %c0_13 = arith.constant 0 : index
    %c0_14 = arith.constant 0 : index
    %29 = vector.load %arg5[%c0_13, %c0_14] : memref<256x36xbf16, #tpu.memory_space<vmem>>, vector<256x36xbf16>
    %c0_15 = arith.constant 0 : index
    %c0_16 = arith.constant 0 : index
    %30 = vector.load %arg2[%c0_15, %c0_16] : memref<36x128xbf16, #tpu.memory_space<vmem>>, vector<36x128xbf16>
    %cst = arith.constant dense<0.000000e+00> : vector<256x128xf32>
    %31 = tpu.matmul %29, %30, %cst {dimension_numbers = #tpu.dot_dimension_numbers<[1], [0], [0], [1], [0, 0, 1, 1], [], []>} : vector<256x36xbf16>, vector<36x128xbf16>, vector<256x128xf32> -> vector<256x128xf32>
    %cst_17 = arith.constant dense<0.000000e+00> : vector<128xf32>
    %32 = vector.multi_reduction <add>, %31, %cst_17 [0] : vector<256x128xf32> to vector<128xf32>
    %33 = vector.shape_cast %32 : vector<128xf32> to vector<1x128xf32>
    %c0_18 = arith.constant 0 : index
    %c0_19 = arith.constant 0 : index
    %c0_20 = arith.constant 0 : index
    %34 = vector.load %arg4[%c0_18, %c0_19, %c0_20] : memref<1x2x128xf32, #tpu.memory_space<vmem>>, vector<1x1x128xf32>
    %35 = vector.shape_cast %34 : vector<1x1x128xf32> to vector<1x128xf32>
    %36 = vector.shape_cast %33 : vector<1x128xf32> to vector<1x1x128xf32>
    tpu.vector_store %arg4[%c0_18, %c0_19, %c0_20], %36 {strides = array<i32>} : memref<1x2x128xf32, #tpu.memory_space<vmem>>, vector<1x1x128xf32>,
    %37 = arith.mulf %31, %31 : vector<256x128xf32>
    %cst_21 = arith.constant dense<0.000000e+00> : vector<128xf32>
    %38 = vector.multi_reduction <add>, %37, %cst_21 [0] : vector<256x128xf32> to vector<128xf32>
    %39 = vector.shape_cast %38 : vector<128xf32> to vector<1x128xf32>
    %c0_22 = arith.constant 0 : index
    %c1 = arith.constant 1 : index
    %c0_23 = arith.constant 0 : index
    %40 = vector.load %arg4[%c0_22, %c1, %c0_23] : memref<1x2x128xf32, #tpu.memory_space<vmem>>, vector<1x1x128xf32>
    %41 = vector.shape_cast %40 : vector<1x1x128xf32> to vector<1x128xf32>
    %42 = vector.shape_cast %39 : vector<1x128xf32> to vector<1x1x128xf32>
    tpu.vector_store %arg4[%c0_22, %c1, %c0_23], %42 {strides = array<i32>} : memref<1x2x128xf32, #tpu.memory_space<vmem>>, vector<1x1x128xf32>,
    %c0_24 = arith.constant 0 : index
    %c0_25 = arith.constant 0 : index
    %c0_26 = arith.constant 0 : index
    %43 = vector.load %arg3[%c0_24, %c0_25, %c0_26] : memref<1x256x128xf32, #tpu.memory_space<vmem>>, vector<1x256x128xf32>
    %44 = vector.shape_cast %43 : vector<1x256x128xf32> to vector<256x128xf32>
    %45 = vector.shape_cast %31 : vector<256x128xf32> to vector<1x256x128xf32>
    tpu.vector_store %arg3[%c0_24, %c0_25, %c0_26], %45 {strides = array<i32>} : memref<1x256x128xf32, #tpu.memory_space<vmem>>, vector<1x256x128xf32>,
    return
  }
  func.func @transform_0(%arg0: i32) -> (i32, i32, i32, i32) {
    %c0_i32 = arith.constant 0 : i32
    %c0_i32_0 = arith.constant 0 : i32
    %c0_i32_1 = arith.constant 0 : i32
    %c0_i32_2 = arith.constant 0 : i32
    return %arg0, %c0_i32, %c0_i32_0, %c0_i32_1 : i32, i32, i32, i32
  }
  func.func @transform_1(%arg0: i32) -> (i32, i32) {
    %c0_i32 = arith.constant 0 : i32
    %c0_i32_0 = arith.constant 0 : i32
    %c0_i32_1 = arith.constant 0 : i32
    return %c0_i32, %c0_i32_0 : i32, i32
  }
  func.func @transform_2(%arg0: i32) -> (i32, i32, i32) {
    %c0_i32 = arith.constant 0 : i32
    %c0_i32_0 = arith.constant 0 : i32
    %c0_i32_1 = arith.constant 0 : i32
    return %arg0, %c0_i32, %c0_i32_0 : i32, i32, i32
  }
  func.func @transform_3(%arg0: i32) -> (i32, i32, i32) {
    %c0_i32 = arith.constant 0 : i32
    %c0_i32_0 = arith.constant 0 : i32
    %c0_i32_1 = arith.constant 0 : i32
    return %arg0, %c0_i32, %c0_i32_0 : i32, i32, i32
  }
}

module attributes {stable_mosaic.version = 11 : i64} {
  func.func @_bn_apply_kernel(%arg0: i32, %arg1: memref<1x256x128xf32, #tpu.memory_space<vmem>>, %arg2: memref<1x128xf32, #tpu.memory_space<vmem>>, %arg3: memref<1x128xf32, #tpu.memory_space<vmem>>, %arg4: memref<1x256x128xf32, #tpu.memory_space<vmem>>) attributes {dimension_semantics = [#tpu.dimension_semantics<parallel>], iteration_bounds = array<i64: 2>, scalar_prefetch = 0 : i64, scratch_operands = 0 : i64, tpu.core_type = #tpu.core_type<tc>, window_params = [{transform_indices = @transform_0, window_bounds = array<i64: 1, 256, 128>}, {pipeline_mode = #tpu.pipeline_mode<synchronous>, transform_indices = @transform_1, window_bounds = array<i64: 1, 128>}, {pipeline_mode = #tpu.pipeline_mode<synchronous>, transform_indices = @transform_2, window_bounds = array<i64: 1, 128>}, {transform_indices = @transform_3, window_bounds = array<i64: 1, 256, 128>}]} {
    %c0 = arith.constant 0 : index
    %c0_0 = arith.constant 0 : index
    %c0_1 = arith.constant 0 : index
    %0 = vector.load %arg1[%c0, %c0_0, %c0_1] : memref<1x256x128xf32, #tpu.memory_space<vmem>>, vector<1x256x128xf32>
    %1 = vector.shape_cast %0 : vector<1x256x128xf32> to vector<256x128xf32>
    %c0_2 = arith.constant 0 : index
    %c0_3 = arith.constant 0 : index
    %2 = vector.load %arg2[%c0_2, %c0_3] : memref<1x128xf32, #tpu.memory_space<vmem>>, vector<1x128xf32>
    %3 = vector.broadcast %2 : vector<1x128xf32> to vector<256x128xf32>
    %4 = arith.mulf %1, %3 : vector<256x128xf32>
    %c0_4 = arith.constant 0 : index
    %c0_5 = arith.constant 0 : index
    %5 = vector.load %arg3[%c0_4, %c0_5] : memref<1x128xf32, #tpu.memory_space<vmem>>, vector<1x128xf32>
    %6 = vector.broadcast %5 : vector<1x128xf32> to vector<256x128xf32>
    %7 = arith.addf %4, %6 : vector<256x128xf32>
    %c0_6 = arith.constant 0 : index
    %c0_7 = arith.constant 0 : index
    %c0_8 = arith.constant 0 : index
    %8 = vector.load %arg4[%c0_6, %c0_7, %c0_8] : memref<1x256x128xf32, #tpu.memory_space<vmem>>, vector<1x256x128xf32>
    %9 = vector.shape_cast %8 : vector<1x256x128xf32> to vector<256x128xf32>
    %10 = vector.shape_cast %7 : vector<256x128xf32> to vector<1x256x128xf32>
    tpu.vector_store %arg4[%c0_6, %c0_7, %c0_8], %10 {strides = array<i32>} : memref<1x256x128xf32, #tpu.memory_space<vmem>>, vector<1x256x128xf32>,
    return
  }
  func.func @transform_0(%arg0: i32) -> (i32, i32, i32) {
    %c0_i32 = arith.constant 0 : i32
    %c0_i32_0 = arith.constant 0 : i32
    %c0_i32_1 = arith.constant 0 : i32
    return %arg0, %c0_i32, %c0_i32_0 : i32, i32, i32
  }
  func.func @transform_1(%arg0: i32) -> (i32, i32) {
    %c0_i32 = arith.constant 0 : i32
    %c0_i32_0 = arith.constant 0 : i32
    %c0_i32_1 = arith.constant 0 : i32
    return %c0_i32, %c0_i32_0 : i32, i32
  }
  func.func @transform_2(%arg0: i32) -> (i32, i32) {
    %c0_i32 = arith.constant 0 : i32
    %c0_i32_0 = arith.constant 0 : i32
    %c0_i32_1 = arith.constant 0 : i32
    return %c0_i32, %c0_i32_0 : i32, i32
  }
  func.func @transform_3(%arg0: i32) -> (i32, i32, i32) {
    %c0_i32 = arith.constant 0 : i32
    %c0_i32_0 = arith.constant 0 : i32
    %c0_i32_1 = arith.constant 0 : i32
    return %arg0, %c0_i32, %c0_i32_0 : i32, i32, i32
  }
}

</mosaic_0001>

<bundles_post_ra>
// kernel: basic_conv2d.3
= control target key start
LH: loop header
LB: loop body
LE: loop exit
PB: predicated region body
PF: predicated region fallthrough
CT: control target
= control target key end

     0   :  { %s419_s12 = smov 0   ;;  %s578_s0 = inlined_call_operand.vmem [shape: f32[2,256,128], index: 0, kind: input, shape index: {}]   ;;  %s579_s1 = inlined_call_operand.vmem [shape: f32[1,128], index: 1, kind: input, shape index: {}]   ;;  %s580_s2 = inlined_call_operand.vmem [shape: f32[1,128], index: 2, kind: input, shape index: {}]   ;;  %s581_s3 = inlined_call_operand.vmem [shape: f32[2,256,128], index: 3, kind: output, shape index: {}]  }
   0x1 LB: > { %s368_s13 = sadd.s32 4294967295, %s397_s12   ;;  %p372_p0 = scmp.ge.s32.totalorder %s397_s12, 1  ;;  %s397_s12 = sphi %s419_s12, %s13_s12  }
   0x2   : > { %p137_p1 = scmp.lt.s32.totalorder %s397_s12, 3 }
   0x4   : > { %p138_p2 = pnand %p372_p0, %p137_p1 }
   0x5   : > { %p161_p3 = scmp.lt.s32.totalorder (!%p138_p2), %s368_s13, 1  ;;  %v430_v0 = vld [vmem:[%s579_s1] ss:$0 sm:$0xff] (!%p138_p2) }
   0x6   : > { %141 = sbr.rel (%p138_p2) target bundleno = 40 (0x28), region = 32  ;;  %v440_v1 = vld [vmem:[%s580_s2] ss:$0 sm:$0xff] (!%p138_p2) }
   0xd   : > { %s583_s13 = smov (!%p161_p3, %s368_s13), 1 }
   0xe   : > { %s381_s14 = sshll.u32 %s583_s13, 8 }
   0xf   : > { %s435_s19 = scalar_lea.vmem %s578_s0, %s381_s14  ;;  %s454_s24 = scalar_lea.vmem %s581_s3, %s381_s14 }
  0x10   : > { %v171_v2 = vld [vmem:[%s435_s19] sm:$0xff]  ;;  %v172_v3 = vld [vmem:[%s435_s19 + $0x8] sm:$0xff]  ;;  %v173_v4 = vld [vmem:[%s435_s19 + $0x10] sm:$0xff] }
  0x11   : > { %v210_v5 = vmul.f32 %v430_v0, %v171_v2  ;;  %v211_v6 = vmul.f32 %v430_v0, %v172_v3  ;;  %v212_v7 = vmul.f32 %v430_v0, %v173_v4  ;;  %v174_v8 = vld [vmem:[%s435_s19 + $0x18] sm:$0xff]  ;;  %v175_v9 = vld [vmem:[%s435_s19 + $0x20] sm:$0xff]  ;;  %v176_v10 = vld [vmem:[%s435_s19 + $0x28] sm:$0xff] }
  0x12   : > { %v213_v11 = vmul.f32 %v430_v0, %v174_v8  ;;  %v214_v12 = vmul.f32 %v430_v0, %v175_v9  ;;  %v215_v13 = vmul.f32 %v430_v0, %v176_v10  ;;  %v177_v14 = vld [vmem:[%s435_s19 + $0x30] sm:$0xff]  ;;  %v178_v15 = vld [vmem:[%s435_s19 + $0x38] sm:$0xff]  ;;  %v179_v16 = vld [vmem:[%s435_s19 + $0x40] sm:$0xff] }
  0x13   : > { %v249_v17 = vadd.f32 %v440_v1, %v210_v5  ;;  %v250_v18 = vadd.f32 %v440_v1, %v211_v6  ;;  %v251_v19 = vadd.f32 %v440_v1, %v212_v7  ;;  %v216_v20 = vmul.f32 %v430_v0, %v177_v14  ;;  %v180_v21 = vld [vmem:[%s435_s19 + $0x48] sm:$0xff]  ;;  %v181_v22 = vld [vmem:[%s435_s19 + $0x50] sm:$0xff]  ;;  %v182_v23 = vld [vmem:[%s435_s19 + $0x58] sm:$0xff] }
  0x14   : > { %v252_v24 = vadd.f32 %v440_v1, %v213_v11  ;;  %v253_v25 = vadd.f32 %v440_v1, %v214_v12  ;;  %v254_v26 = vadd.f32 %v440_v1, %v215_v13  ;;  %v217_v27 = vmul.f32 %v430_v0, %v178_v15  ;;  %v183_v28 = vld [vmem:[%s435_s19 + $0x60] sm:$0xff]  ;;  %v184_v29 = vld [vmem:[%s435_s19 + $0x68] sm:$0xff]  ;;  %v185_v30 = vld [vmem:[%s435_s19 + $0x70] sm:$0xff] }
  0x15   : > { %281 = vst [vmem:[%s454_s24] sm:$0xff] %v249_v17  ;;  %282 = vst [vmem:[%s454_s24 + $0x8] sm:$0xff] %v250_v18  ;;  %v255_v31 = vadd.f32 %v440_v1, %v216_v20  ;;  %v218_v32 = vmul.f32 %v430_v0, %v179_v16  ;;  %v219_v33 = vmul.f32 %v430_v0, %v180_v21  ;;  %v186_v35 = vld [vmem:[%s435_s19 + $0x78] sm:$0xff]  ;;  %v187_v40 = vld [vmem:[%s435_s19 + $0x80] sm:$0xff] }
  0x16   : > { %283 = vst [vmem:[%s454_s24 + $0x10] sm:$0xff] %v251_v19  ;;  %v220_v34 = vmul.f32 %v430_v0, %v181_v22  ;;  %284 = vst [vmem:[%s454_s24 + $0x18] sm:$0xff] %v252_v24  ;;  %v256_v36 = vadd.f32 %v440_v1, %v217_v27  ;;  %v221_v37 = vmul.f32 %v430_v0, %v182_v23  ;;  %v188_v41 = vld [vmem:[%s435_s19 + $0x88] sm:$0xff]  ;;  %v189_v42 = vld [vmem:[%s435_s19 + $0x90] sm:$0xff] }
  0x17   : > { %285 = vst [vmem:[%s454_s24 + $0x20] sm:$0xff] %v253_v25  ;;  %286 = vst [vmem:[%s454_s24 + $0x28] sm:$0xff] %v254_v26  ;;  %v222_v38 = vmul.f32 %v430_v0, %v183_v28  ;;  %v223_v39 = vmul.f32 %v430_v0, %v184_v29  ;;  %v257_v43 = vadd.f32 %v440_v1, %v218_v32  ;;  %v190_v47 = vld [vmem:[%s435_s19 + $0x98] sm:$0xff]  ;;  %v191_v48 = vld [vmem:[%s435_s19 + $0xa0] sm:$0xff] }
  0x18   : > { %287 = vst [vmem:[%s454_s24 + $0x30] sm:$0xff] %v255_v31  ;;  %v258_v44 = vadd.f32 %v440_v1, %v219_v33  ;;  %v259_v45 = vadd.f32 %v440_v1, %v220_v34  ;;  %v224_v46 = vmul.f32 %v430_v0, %v185_v30  ;;  %v192_v49 = vld [vmem:[%s435_s19 + $0xa8] sm:$0xff]  ;;  %288 = vst [vmem:[%s454_s24 + $0x38] sm:$0xff] %v256_v36  ;;  %v193_v54 = vld [vmem:[%s435_s19 + $0xb0] sm:$0xff] }
  0x19   : > { %v260_v50 = vadd.f32 %v440_v1, %v221_v37  ;;  %v261_v51 = vadd.f32 %v440_v1, %v222_v38  ;;  %v262_v52 = vadd.f32 %v440_v1, %v223_v39  ;;  %v225_v53 = vmul.f32 %v430_v0, %v186_v35  ;;  %289 = vst [vmem:[%s454_s24 + $0x40] sm:$0xff] %v257_v43  ;;  %v194_v59 = vld [vmem:[%s435_s19 + $0xb8] sm:$0xff]  ;;  %v195_v2 = vld [vmem:[%s435_s19 + $0xc0] sm:$0xff]  ;;  %v196_v3 = vld [vmem:[%s435_s19 + $0xc8] sm:$0xff] }
  0x1a   : > { %290 = vst [vmem:[%s454_s24 + $0x48] sm:$0xff] %v258_v44  ;;  %291 = vst [vmem:[%s454_s24 + $0x50] sm:$0xff] %v259_v45  ;;  %v263_v55 = vadd.f32 %v440_v1, %v224_v46  ;;  %v226_v56 = vmul.f32 %v430_v0, %v187_v40  ;;  %v227_v57 = vmul.f32 %v430_v0, %v188_v41  ;;  %v197_v4 = vld [vmem:[%s435_s19 + $0xd0] sm:$0xff]  ;;  %v198_v9 = vld [vmem:[%s435_s19 + $0xd8] sm:$0xff] }
  0x1b   : > { %v228_v58 = vmul.f32 %v430_v0, %v189_v42  ;;  %292 = vst [vmem:[%s454_s24 + $0x58] sm:$0xff] %v260_v50  ;;  %293 = vst [vmem:[%s454_s24 + $0x60] sm:$0xff] %v261_v51  ;;  %v264_v60 = vadd.f32 %v440_v1, %v225_v53  ;;  %v229_v61 = vmul.f32 %v430_v0, %v190_v47  ;;  %v199_v10 = vld [vmem:[%s435_s19 + $0xe0] sm:$0xff]  ;;  %v200_v11 = vld [vmem:[%s435_s19 + $0xe8] sm:$0xff] }
  0x1c   : > { %294 = vst [vmem:[%s454_s24 + $0x68] sm:$0xff] %v262_v52  ;;  %v230_v62 = vmul.f32 %v430_v0, %v191_v48  ;;  %v231_v63 = vmul.f32 %v430_v0, %v192_v49  ;;  %295 = vst [vmem:[%s454_s24 + $0x70] sm:$0xff] %v263_v55  ;;  %v265_v5 = vadd.f32 %v440_v1, %v226_v56  ;;  %v201_v16 = vld [vmem:[%s435_s19 + $0xf0] sm:$0xff]  ;;  %v202_v21 = vld [vmem:[%s435_s19 + $0xf8] sm:$0xff] }
  0x1d   : > { %v266_v6 = vadd.f32 %v440_v1, %v227_v57  ;;  %v267_v7 = vadd.f32 %v440_v1, %v228_v58  ;;  %v232_v8 = vmul.f32 %v430_v0, %v193_v54  ;;  %296 = vst [vmem:[%s454_s24 + $0x78] sm:$0xff] %v264_v60  ;;  %v268_v12 = vadd.f32 %v440_v1, %v229_v61 }
  0x1e   : > { %v269_v13 = vadd.f32 %v440_v1, %v230_v62  ;;  %v270_v14 = vadd.f32 %v440_v1, %v231_v63  ;;  %v233_v15 = vmul.f32 %v430_v0, %v194_v59  ;;  %297 = vst [vmem:[%s454_s24 + $0x80] sm:$0xff] %v265_v5  ;;  %v234_v18 = vmul.f32 %v430_v0, %v195_v2 }
  0x1f   : > { %298 = vst [vmem:[%s454_s24 + $0x88] sm:$0xff] %v266_v6  ;;  %299 = vst [vmem:[%s454_s24 + $0x90] sm:$0xff] %v267_v7  ;;  %v271_v17 = vadd.f32 %v440_v1, %v232_v8  ;;  %v235_v19 = vmul.f32 %v430_v0, %v196_v3  ;;  %v236_v20 = vmul.f32 %v430_v0, %v197_v4 }
  0x20   : > { %300 = vst [vmem:[%s454_s24 + $0x98] sm:$0xff] %v268_v12  ;;  %301 = vst [vmem:[%s454_s24 + $0xa0] sm:$0xff] %v269_v13  ;;  %v272_v22 = vadd.f32 %v440_v1, %v233_v15  ;;  %v237_v23 = vmul.f32 %v430_v0, %v198_v9  ;;  %v238_v24 = vmul.f32 %v430_v0, %v199_v10 }
  0x21   : > { %302 = vst [vmem:[%s454_s24 + $0xa8] sm:$0xff] %v270_v14  ;;  %v239_v25 = vmul.f32 %v430_v0, %v200_v11  ;;  %303 = vst [vmem:[%s454_s24 + $0xb0] sm:$0xff] %v271_v17  ;;  %v273_v26 = vadd.f32 %v440_v1, %v234_v18  ;;  %v274_v27 = vadd.f32 %v440_v1, %v235_v19 }
  0x22   : > { %v275_v28 = vadd.f32 %v440_v1, %v236_v20  ;;  %v240_v29 = vmul.f32 %v430_v0, %v201_v16  ;;  %304 = vst [vmem:[%s454_s24 + $0xb8] sm:$0xff] %v272_v22  ;;  %v276_v30 = vadd.f32 %v440_v1, %v237_v23  ;;  %v277_v31 = vadd.f32 %v440_v1, %v238_v24 }
  0x23   : > { %v278_v32 = vadd.f32 %v440_v1, %v239_v25  ;;  %v241_v33 = vmul.f32 %v430_v0, %v202_v21  ;;  %305 = vst [vmem:[%s454_s24 + $0xc0] sm:$0xff] %v273_v26  ;;  %306 = vst [vmem:[%s454_s24 + $0xc8] sm:$0xff] %v274_v27 }
  0x24   : > { %307 = vst [vmem:[%s454_s24 + $0xd0] sm:$0xff] %v275_v28  ;;  %v279_v34 = vadd.f32 %v440_v1, %v240_v29  ;;  %308 = vst [vmem:[%s454_s24 + $0xd8] sm:$0xff] %v276_v30 }
  0x25   : > { %309 = vst [vmem:[%s454_s24 + $0xe0] sm:$0xff] %v277_v31  ;;  %310 = vst [vmem:[%s454_s24 + $0xe8] sm:$0xff] %v278_v32  ;;  %v280_v35 = vadd.f32 %v440_v1, %v241_v33 }
  0x26   : > { %311 = vst [vmem:[%s454_s24 + $0xf0] sm:$0xff] %v279_v34 }
  0x27   : > { %312 = vst [vmem:[%s454_s24 + $0xf8] sm:$0xff] %v280_v35 }
  0x28 PF: > { %s13_s12 = sadd.s32 1, %s397_s12  }
  0x29   : > { %p10_p4 = scmp.ge.s32.totalorder %s13_s12, 4  }
  0x2b   :  { %12 = sbr.rel (!%p10_p4) target bundleno = 1 (0x1), region = 62 }

// kernel: basic_conv2d.2
= control target key start
LH: loop header
LB: loop body
LE: loop exit
PB: predicated region body
PF: predicated region fallthrough
CT: control target
= control target key end

     0   :  { %s2287_s12 = smov 0   ;;  %s3238_s0 = inlined_call_operand.vmem [shape: bf16[2,18,18,4], index: 0, kind: input, shape index: {}]   ;;  %s3239_s1 = inlined_call_operand.vmem [shape: bf16[36,128], index: 1, kind: input, shape index: {}]   ;;  %s3240_s2 = inlined_call_operand.vmem [shape: f32[2,256,128], index: 2, kind: output, shape index: {0}]   ;;  %s3241_s3 = inlined_call_operand.vmem [shape: f32[2,2,128], index: 3, kind: output, shape index: {1}]  }
   0x1 LB: > { %s2046_s13 = sadd.s32 4294967295, %s2257_s12   ;;  %p2050_p0 = scmp.ge.s32.totalorder %s2257_s12, 1  ;;  %s2257_s12 = sphi %s2287_s12, %s14_s12  }
   0x2   : > { %p140_p1 = scmp.lt.s32.totalorder %s2257_s12, 3 }
   0x4   : > { %p141_p2 = pnand %p2050_p0, %p140_p1 }
   0x5   : > { %p168_p3 = scmp.lt.s32.totalorder (!%p141_p2), %s2046_s13, 1  ;;  %vm333_vm0 = vcmask (!%p141_p2), 31744   ;;  %vm866_vm1 = vcmask (!%p141_p2), 1042432   ;;  %vm867_vm2 = vcmask (!%p141_p2), 1046532   ;;  %vm350_vm3 = vsmask.f32 (!%p141_p2), 3328 }
   0x6   : > { %144 = sbr.rel (%p141_p2) target bundleno = 639 (0x27f), region = 28  ;;  %vm351_vm4 = vsmask.f32 (!%p141_p2), 7440  ;;  %vm2321_vm5 = vmor (!%p141_p2), %vm866_vm1, %vm867_vm2  ;;  %s2259_s18 = smov (!%p141_p2), 12   ;;  %vm1655_vm7 = vcmask (!%p141_p2), 1041408   ;;  %vm833_vm8 = vcmask (!%p141_p2), 64544  }
   0x7   : > { %s2260_s19 = smov (!%p141_p2), 20   ;;  %vm2358_vm6 = vmor (!%p141_p2), %vm350_vm3, %vm351_vm4  ;;  %s2261_s20 = smov (!%p141_p2), 8   ;;  %vm1077_vm9 = vcmask (!%p141_p2), 97344   ;;  %vm1147_vm10 = vcmask (!%p141_p2), 130144   ;;  %vm1239_vm11 = vcmask (!%p141_p2), 162944   ;;  %vm1315_vm12 = vcmask (!%p141_p2), 195744  }
   0x8   : > { %s2262_s21 = smov (!%p141_p2), 4   ;;  %s2263_s24 = smov (!%p141_p2), 16   ;;  %vm1385_vm13 = vcmask (!%p141_p2), 228544   ;;  %vm1477_vm14 = vcmask (!%p141_p2), 261344   ;;  %vm1553_vm15 = vcmask (!%p141_p2), 294144  }
   0x9   : > { %s2264_s27 = smov (!%p141_p2), 24   ;;  %s2265_s28 = smov (!%p141_p2), 28  }
   0xa   : > { %s2266_s29 = smov (!%p141_p2), 32  }
   0xd   : > { %s3247_s13 = smov (!%p168_p3, %s2046_s13), 1 }
   0xe   : > { %s2214_s14 = smul.u32 216, %s3247_s13  ;;  %s2148_s5 = sshll.u32 %s3247_s13, 8 }
   0xf   : > { %s3193_s8 = scalar_lea.vmem %s3240_s2, %s2148_s5  ;;  %s2054_s9 = sshll.u32 %s3247_s13, 1 }
  0x10   : > { %s2301_s17 = scalar_lea.vmem %s3238_s0, %s2214_s14  ;;  %s181_s14 = scalar_lea.vmem %s3241_s3, %s2054_s9 }
  0x11   : > { %v2304_v0 = vld [vmem:[%s2301_s17 + $0x18] sm:$0xf]  ;;  %v2307_v1 = vld [vmem:[%s2301_s17 + $0x1c] sm:$0xf]  ;;  %v186_v2 = vld [vmem:[%s2301_s17 + $0xc] sm:$0xf] }
  0x12   : > { %v2312_v3 = vcombine.low %v2304_v0, %v2307_v1  ;;  %v402_v4 = vshrl.u32 %v2304_v0, 16  ;;  %v405_v5 = vshll.u32 %v2304_v0, 16  ;;  %v415_v6 = vshrl.u32 %v2307_v1, 16  ;;  %v187_v7 = vld [vmem:[%s2301_s17 + $0x10] sm:$0xf] }
  0x13   : > { %v2056_v8 = vcombine.low %v186_v2, %v187_v7  ;;  %v378_v9 = vshrl.u32 %v186_v2, 16  ;;  %v381_v10 = vshll.u32 %v186_v2, 16  ;;  %v387_v11 = vshll.u32 %v187_v7, 16  ;;  %v188_v12 = vld [vmem:[%s2301_s17 + $0x14] sm:$0x1] }
  0x14   : > { %1101 = vrot.lane.b32.xlu1 %v2312_v3, %s2259_s18  ;;  %v391_v14 = vshrl.u32 %v187_v7, 16  ;;  %336 = vst.msk [vmem:[#allocation2 + $0x10] sm:$0xff] %vm333_vm0, %v2312_v3  ;;  %v2088_v15 = vrot.slane %v186_v2, 9  ;;  %v878_v16 = vrot.slane %v187_v7, 5  ;;  %v881_v17 = vrot.slane %v188_v12, 5 }
  0x15   : > { %v2330_v18 = vld [vmem:[%s2301_s17] sm:$0xf]  ;;  %v380_v19 = vrot.slane %v378_v9, 4  ;;  %v383_v20 = vrot.slane %v381_v10, 5  ;;  %1099 = vrot.lane.b32.xlu0 %v2056_v8, %s2259_s18  ;;  %335 = vst.msk [vmem:[#allocation2 + $0x8] sm:$0xff] %vm333_vm0, %v2056_v8  ;;  %v2089_v45 = vrot.slane %v2304_v0, 9 }
  0x16   : > { %v2335_v21 = vld [vmem:[%s2301_s17 + $0x4] sm:$0xf]  ;;  %v185_v22 = vld [vmem:[%s2301_s17 + $0x8] sm:$0x1]  ;;  %v393_v23 = vrot.slane %v391_v14, 4  ;;  %v879_v24 = vsel %vm2321_vm5, %v2088_v15, %v878_v16  ;;  %v880_v25 = vrot.slane %v878_v16, 4 }
  0x17   : > { %v2087_v26 = vrot.slane %v2330_v18, 9  ;;  %v871_v27 = vrot.slane %v2335_v21, 5  ;;  %v874_v28 = vrot.slane %v185_v22, 5  ;;  %v354_v29 = vshrl.u32 %v2330_v18, 16  ;;  %v191_v35 = vld [vmem:[%s2301_s17 + $0x20] sm:$0x1] }
  0x18   : > { %v357_v30 = vshll.u32 %v2330_v18, 16  ;;  %v882_v31 = vsel %vm2321_vm5, %v880_v25, %v881_v17  ;;  %v363_v32 = vshll.u32 %v2335_v21, 16  ;;  %v367_v33 = vshrl.u32 %v2335_v21, 16  ;;  %v2372_v7 = vld [vmem:[%s2301_s17 + $0x24] sm:$0xf] }
  0x19   : > { %v373_v34 = vshll.u32 %v185_v22, 16  ;;  %v2104_v36 = vcombine.low %v879_v24, %v882_v31  ;;  %v872_v37 = vsel %vm2321_vm5, %v2087_v26, %v871_v27  ;;  %v873_v38 = vrot.slane %v871_v27, 4  ;;  %v194_v25 = vld [vmem:[%s2301_s17 + $0x2c] sm:$0x1] }
  0x1a   : > { %v356_v39 = vrot.slane %v354_v29, 4  ;;  %v359_v40 = vrot.slane %v357_v30, 5  ;;  %v365_v41 = vrot.slane %v363_v32, 5  ;;  %v369_v42 = vrot.slane %v367_v33, 4 }
  0x1b   : > { %v375_v43 = vrot.slane %v373_v34, 5  ;;  %1267 = vrot.lane.b32.xlu0 %v2104_v36, %s2260_s19  ;;  %v875_v44 = vsel %vm2321_vm5, %v873_v38, %v874_v28  ;;  %v885_v46 = vrot.slane %v2307_v1, 5  ;;  %v888_v47 = vrot.slane %v191_v35, 5  ;;  %v2404_v38 = vld [vmem:[%s2301_s17 + $0x30] sm:$0xf] }
  0x1c   : > { %v2103_v48 = vcombine.low %v872_v37, %v875_v44  ;;  %v360_v49 = vor.u32 %v359_v40, %v356_v39  ;;  %v370_v50 = vor.u32 %v369_v42, %v365_v41  ;;  %v384_v51 = vor.u32 %v383_v20, %v380_v19  ;;  %v2407_v39 = vld [vmem:[%s2301_s17 + $0x34] sm:$0xf] }
  0x1d   : > { %v886_v53 = vsel %vm2321_vm5, %v2089_v45, %v885_v46  ;;  %v887_v54 = vrot.slane %v885_v46, 4  ;;  %v389_v55 = vrot.slane %v387_v11, 5  ;;  %v397_v56 = vshll.u32 %v188_v12, 16  ;;  %v2241_v45 = vld [vmem:[%s3239_s1] sm:$0xff]  }
  0x1e   : > { %1029 = vrot.lane.b32.xlu1 %v2103_v48, %s2261_s20  ;;  %v361_v57 = vrot.slane %v360_v49, 4  ;;  %v371_v58 = vrot.slane %v370_v50, 4  ;;  %v385_v59 = vrot.slane %v384_v51, 4  ;;  %v404_v60 = vrot.slane %v402_v4, 4  ;;  %2168 = vmatprep.subr.bf16.mxu0 %v2241_v45 }
  0x1f   : > { %v889_v61 = vsel %vm2321_vm5, %v887_v54, %v888_v47  ;;  %v394_v62 = vor.u32 %v393_v23, %v389_v55  ;;  %v399_v63 = vrot.slane %v397_v56, 5  ;;  %v407_v2 = vrot.slane %v405_v5, 5  ;;  %v193_v5 = vld [vmem:[%s2301_s17 + $0x28] sm:$0xf]  ;;  %v2429_v54 = vld [vmem:[%s2301_s17 + $0x38] sm:$0x1]  ;;  %2169 = vmatpush3.bf16.msra.mxu0 %v2241_v45  ;;  %2206 = vmatprep.subr.bf16.mxu1 %v2241_v45 }
  0x20   : > { %v366_v8 = vsel %vm2358_vm6, %v361_v57, %v365_v41  ;;  %v376_v9 = vsel %vm2358_vm6, %v371_v58, %v375_v43  ;;  %v2378_v10 = vcombine.low %v886_v53, %v889_v61  ;;  %v390_v4 = vsel %vm2358_vm6, %v385_v59, %v389_v55  ;;  %v2432_v55 = vld [vmem:[%s2301_s17 + $0x3c] sm:$0xf]  ;;  %v2242_v61 = vld [vmem:[%s3239_s1 + $0x8] sm:$0xff]   ;;  %2209 = vmatpush3.bf16.msra.mxu1 %v2241_v45 }
  0x21   : > { %v2071_v11 = vcombine.low %v366_v8, %v376_v9  ;;  %v395_v12 = vrot.slane %v394_v62, 4  ;;  %v408_v14 = vor.u32 %v407_v2, %v404_v60  ;;  %v411_v0 = vshll.u32 %v2307_v1, 16  ;;  %v2441_v60 = vld [vmem:[%s2301_s17 + $0x40] sm:$0xf]  ;;  %2170 = vmatprep.subr.bf16.mxu0 %v2242_v61  ;;  %2207 = vmatprep.subr.bf16.mxu1 %v2242_v61 }
  0x22   : > { %1031 = vrot.lane.b32.xlu1 %v2104_v36, %s2261_s20  ;;  %v417_v15 = vrot.slane %v415_v6, 4  ;;  %v421_v16 = vshll.u32 %v191_v35, 16  ;;  %v2388_v17 = vcombine.low %v2372_v7, %v193_v5  ;;  %v426_v19 = vshrl.u32 %v2372_v7, 16 }
  0x23   : > { %785 = vrot.lane.b32.xlu0 %v2071_v11, %s2262_s21  ;;  %v400_v20 = vsel %vm2358_vm6, %v395_v12, %v399_v63  ;;  %v409_v22 = vrot.slane %v408_v14, 4  ;;  %v413_v23 = vrot.slane %v411_v0, 5  ;;  %v429_v24 = vshll.u32 %v2372_v7, 16  ;;  %2171 = vmatpush3.bf16.msra.mxu0 %v2242_v61 }
  0x24   : > { %v2072_v26 = vcombine.low %v390_v4, %v400_v20  ;;  %v439_v1 = vshrl.u32 %v193_v5, 16  ;;  %337 = vst.msk [vmem:[#allocation2 + $0x18] sm:$0xff] %vm333_vm0, %v2388_v17  ;;  %v428_v6 = vrot.slane %v426_v19, 4  ;;  %v423_v28 = vrot.slane %v421_v16, 5  ;;  %2210 = vmatpush3.bf16.msra.mxu1 %v2242_v61 }
  0x25   : > { %v418_v27 = vor.u32 %v417_v15, %v413_v23  ;;  %v431_v29 = vrot.slane %v429_v24, 5  ;;  %v435_v30 = vshll.u32 %v193_v5, 16  ;;  %v445_v32 = vshll.u32 %v194_v25, 16 }
  0x26   : > { %1269 = vrot.lane.b32.xlu1 %v2378_v10, %s2260_s19  ;;  %v441_v31 = vrot.slane %v439_v1, 4  ;;  %v892_v33 = vrot.slane %v193_v5, 5  ;;  %v414_v34 = vsel %vm2358_vm6, %v409_v22, %v413_v23  ;;  %v2411_v40 = vcombine.low %v2404_v38, %v2407_v39  ;;  %v2469_v5 = vld [vmem:[%s2301_s17 + $0x44] sm:$0x1]  ;;  %v2475_v23 = vld [vmem:[%s2301_s17 + $0x48] sm:$0xf] }
  0x27   : > { %787 = vrot.lane.b32.xlu0 %v2072_v26, %s2262_s21  ;;  %v419_v35 = vrot.slane %v418_v27, 4  ;;  %v432_v36 = vor.u32 %v431_v29, %v428_v6  ;;  %v437_v37 = vrot.slane %v435_v30, 5  ;;  %v447_v44 = vrot.slane %v445_v32, 5 }
  0x28   : > { %v2090_v47 = vrot.slane %v2372_v7, 9  ;;  %v894_v48 = vrot.slane %v892_v33, 4  ;;  %v895_v49 = vrot.slane %v194_v25, 5  ;;  %338 = vst.msk [vmem:[#allocation2 + $0x20] sm:$0xff] %vm333_vm0, %v2411_v40  ;;  %v450_v51 = vshrl.u32 %v2404_v38, 16 }
  0x29   : > { %v424_v41 = vsel %vm2358_vm6, %v419_v35, %v423_v28  ;;  %v433_v42 = vrot.slane %v432_v36, 4  ;;  %v442_v43 = vor.u32 %v441_v31, %v437_v37  ;;  %v453_v53 = vshll.u32 %v2404_v38, 16  ;;  %v2489_v28 = vld [vmem:[%s2301_s17 + $0x4c] sm:$0xf] }
  0x2a   : > { %v2418_v46 = vcombine.low %v414_v34, %v424_v41  ;;  %v463_v58 = vshrl.u32 %v2407_v39, 16  ;;  %v459_v59 = vshll.u32 %v2407_v39, 16  ;;  %v893_v62 = vsel %vm2321_vm5, %v2090_v47, %v892_v33  ;;  %v2499_v33 = vld [vmem:[%s2301_s17 + $0x50] sm:$0x1] }
  0x2b   : > { %1191 = vrot.lane.b32.xlu0 %v2072_v26, %s2263_s24  ;;  %v443_v50 = vrot.slane %v442_v43, 4  ;;  %v438_v56 = vsel %vm2358_vm6, %v433_v42, %v437_v37  ;;  %v896_v63 = vsel %vm2321_vm5, %v894_v48, %v895_v49  ;;  %v452_v2 = vrot.slane %v450_v51, 4 }
  0x2c   : > { %1193 = vrot.lane.b32.xlu1 %v2418_v46, %s2263_s24  ;;  %v455_v7 = vrot.slane %v453_v53, 5  ;;  %v2454_v8 = vcombine.low %v2432_v55, %v2441_v60  ;;  %v474_v9 = vshrl.u32 %v2432_v55, 16  ;;  %v469_v11 = vshll.u32 %v2429_v54, 16  ;;  %v2518_v53 = vld [vmem:[%s2301_s17 + $0x54] sm:$0xf] }
  0x2d   : > { %v448_v57 = vsel %vm2358_vm6, %v443_v50, %v447_v44  ;;  %v477_v12 = vshll.u32 %v2432_v55, 16  ;;  %v2464_v14 = vrot.slane %v459_v59, 5  ;;  %v465_v0 = vrot.slane %v463_v58, 4  ;;  %v2523_v59 = vld [vmem:[%s2301_s17 + $0x58] sm:$0xf] }
  0x2e   : > { %v2459_v4 = vcombine.low %v438_v56, %v448_v57  ;;  %339 = vst.msk [vmem:[#allocation2 + $0x28] sm:$0xff] %vm333_vm0, %v2454_v8  ;;  %v483_v15 = vshll.u32 %v2441_v60, 16  ;;  %v2091_v16 = vrot.slane %v2404_v38, 9  ;;  %v899_v19 = vrot.slane %v2407_v39, 5 }
  0x2f   : > { %1337 = vrot.lane.b32.xlu0 %v2312_v3, %s2264_s27  ;;  %v487_v3 = vshrl.u32 %v2441_v60, 16  ;;  %v476_v20 = vrot.slane %v474_v9, 4  ;;  %v479_v22 = vrot.slane %v477_v12, 5  ;;  %v2479_v24 = vcombine.low %v893_v62, %v896_v63 }
  0x30   : > { %1339 = vrot.lane.b32.xlu1 %v2388_v17, %s2264_s27  ;;  %v902_v25 = vrot.slane %v2429_v54, 5  ;;  %v456_v26 = vor.u32 %v455_v7, %v452_v2  ;;  %v2484_v1 = vrot.slane %v469_v11, 5  ;;  %v2486_v6 = vrot.slane %v483_v15, 5 }
  0x31   : > { %v489_v27 = vrot.slane %v487_v3, 4  ;;  %v466_v29 = vor.u32 %v465_v0, %v2464_v14  ;;  %v493_v30 = vshll.u32 %v2469_v5, 16  ;;  %v2495_v31 = vcombine.low %v2475_v23, %v2489_v28 }
  0x32   : > { %v498_v32 = vshrl.u32 %v2475_v23, 16  ;;  %v2503_v34 = vsel %vm2321_vm5, %v2091_v16, %v899_v19  ;;  %v901_v35 = vrot.slane %v899_v19, 4  ;;  %v480_v36 = vor.u32 %v479_v22, %v476_v20  ;;  %v2553_v22 = vld [vmem:[%s2301_s17 + $0x5c] sm:$0x1] }
  0x33   : > { %1429 = vrot.lane.b32.xlu0 %v2418_v46, %s2265_s28  ;;  %v501_v37 = vshll.u32 %v2475_v23, 16  ;;  %v906_v38 = vrot.slane %v2441_v60, 5  ;;  %v511_v39 = vshrl.u32 %v2489_v28, 16  ;;  %340 = vst.msk [vmem:[#allocation2 + $0x30] sm:$0xff] %vm333_vm0, %v2495_v31  ;;  %v507_v42 = vshll.u32 %v2489_v28, 16 }
  0x34   : > { %1431 = vrot.lane.b32.xlu1 %v2459_v4, %s2265_s28  ;;  %v500_v41 = vrot.slane %v498_v32, 4  ;;  %v457_v43 = vrot.slane %v456_v26, 4  ;;  %v490_v44 = vor.u32 %v489_v27, %v2486_v6  ;;  %v517_v47 = vshll.u32 %v2499_v33, 16  ;;  %v2576_v32 = vld [vmem:[%s2301_s17 + $0x64] sm:$0xf] }
  0x35   : > { %v503_v45 = vrot.slane %v501_v37, 5  ;;  %v467_v48 = vrot.slane %v466_v29, 4  ;;  %v495_v49 = vrot.slane %v493_v30, 5  ;;  %v509_v50 = vrot.slane %v507_v42, 5 }
  0x36   : > { %v513_v51 = vrot.slane %v511_v39, 4  ;;  %v481_v54 = vrot.slane %v480_v36, 4  ;;  %v2092_v56 = vrot.slane %v2432_v55, 9  ;;  %v909_v57 = vrot.slane %v2469_v5, 5 }
  0x37   : > { %1505 = vrot.lane.b32.xlu0 %v2378_v10, %s2266_s29  ;;  %v504_v58 = vor.u32 %v503_v45, %v500_v41  ;;  %v913_v61 = vrot.slane %v2489_v28, 5  ;;  %v2530_v62 = vcombine.low %v2518_v53, %v2523_v59  ;;  %v491_v55 = vrot.slane %v490_v44, 4 }
  0x38   : > { %789 = vrot.lane.b32.xlu1 %v2418_v46, %s2262_s21  ;;  %v908_v46 = vrot.slane %v906_v38, 4  ;;  %v514_v60 = vor.u32 %v513_v51, %v509_v50  ;;  %v519_v63 = vrot.slane %v517_v47, 5  ;;  %v522_v2 = vshrl.u32 %v2518_v53, 16  ;;  %v2608_v47 = vld [vmem:[%s2301_s17 + $0x68] sm:$0x1] }
  0x39   : > { %v525_v7 = vshll.u32 %v2518_v53, 16  ;;  %v505_v9 = vrot.slane %v504_v58, 4  ;;  %v2093_v12 = vrot.slane %v2475_v23, 9  ;;  %v535_v3 = vshrl.u32 %v2523_v59, 16  ;;  %341 = vst.msk [vmem:[#allocation2 + $0x38] sm:$0xff] %vm333_vm0, %v2530_v62 }
  0x3a   : > { %v515_v11 = vrot.slane %v514_v60, 4  ;;  %v903_v0 = vsel %vm2321_vm5, %v901_v35, %v902_v25  ;;  %v915_v5 = vrot.slane %v913_v61, 4  ;;  %v916_v15 = vrot.slane %v2499_v33, 5 }
  0x3b   : > { %1507 = vrot.lane.b32.xlu0 %v2479_v24, %s2266_s29  ;;  %v531_v16 = vshll.u32 %v2523_v59, 16  ;;  %v462_v19 = vsel %vm2358_vm6, %v457_v43, %v2464_v14  ;;  %v472_v20 = vsel %vm2358_vm6, %v467_v48, %v2484_v1  ;;  %v524_v23 = vrot.slane %v522_v2, 4  ;;  %v210_v48 = vld [vmem:[%s2301_s17 + $0x6c] sm:$0xf] }
  0x3c   : > { %791 = vrot.lane.b32.xlu1 %v2459_v4, %s2262_s21  ;;  %v527_v25 = vrot.slane %v525_v7, 5  ;;  %v496_v26 = vsel %vm2358_vm6, %v491_v55, %v495_v49  ;;  %v907_v14 = vsel %vm2321_vm5, %v2092_v56, %v906_v38  ;;  %v910_v1 = vsel %vm2321_vm5, %v908_v46, %v909_v57  ;;  %v212_v55 = vld [vmem:[%s2301_s17 + $0x74] sm:$0x1] }
  0x3d   : > { %v510_v27 = vsel %vm2358_vm6, %v505_v9, %v509_v50  ;;  %v520_v28 = vsel %vm2358_vm6, %v515_v11, %v519_v63  ;;  %v914_v29 = vsel %vm2321_vm5, %v2093_v12, %v913_v61  ;;  %v537_v30 = vrot.slane %v535_v3, 4 }
  0x3e   : > { %v917_v33 = vsel %vm2321_vm5, %v915_v5, %v916_v15  ;;  %v2580_v35 = vrot.slane %v531_v16, 5  ;;  %v541_v36 = vshll.u32 %v2553_v22, 16  ;;  %v528_v38 = vor.u32 %v527_v25, %v524_v23 }
  0x3f   : > { %1033 = vrot.lane.b32.xlu0 %v2378_v10, %s2261_s20  ;;  %v486_v10 = vsel %vm2358_vm6, %v481_v54, %v2486_v6  ;;  %v2573_v6 = vld [vmem:[%s2301_s17 + $0x60] sm:$0xf]  ;;  %v2591_v39 = vcombine.low %v462_v19, %v472_v20  ;;  %v2594_v41 = vcombine.low %v2503_v34, %v903_v0  ;;  %v2596_v42 = vcombine.low %v907_v14, %v910_v1  ;;  %v211_v54 = vld [vmem:[%s2301_s17 + $0x70] sm:$0xf] }
  0x40   : > { %1035 = vrot.lane.b32.xlu1 %v2479_v24, %s2261_s20  ;;  %v2585_v37 = vcombine.low %v2573_v6, %v2576_v32  ;;  %v2600_v43 = vcombine.low %v486_v10, %v496_v26  ;;  %v2602_v44 = vcombine.low %v510_v27, %v520_v28  ;;  %v2094_v45 = vrot.slane %v2518_v53, 9 }
  0x41   : > { %v538_v34 = vor.u32 %v537_v30, %v2580_v35  ;;  %v2612_v49 = vrot.slane %v541_v36, 5  ;;  %v920_v50 = vrot.slane %v2523_v59, 5  ;;  %v923_v51 = vrot.slane %v2553_v22, 5  ;;  %v214_v36 = vld [vmem:[%s2301_s17 + $0x7c] sm:$0xf] }
  0x42   : > { %342 = vst.msk [vmem:[#allocation2 + $0x40] sm:$0xff] %vm333_vm0, %v2585_v37  ;;  %v2619_v56 = vrot.slane %v528_v38, 4  ;;  %v2095_v53 = vrot.slane %v2573_v6, 9  ;;  %v927_v57 = vrot.slane %v2576_v32, 5  ;;  %v930_v58 = vrot.slane %v2608_v47, 5 }
  0x43   : > { %1103 = vrot.lane.b32.xlu0 %v2388_v17, %s2259_s18  ;;  %v2604_v17 = vcombine.low %v914_v29, %v917_v33  ;;  %v546_v46 = vshrl.u32 %v2573_v6, 16  ;;  %v549_v59 = vshll.u32 %v2573_v6, 16  ;;  %v2628_v60 = vcombine.low %v210_v48, %v211_v54  ;;  %v213_v29 = vld [vmem:[%s2301_s17 + $0x78] sm:$0xf] }
  0x44   : > { %1105 = vrot.lane.b32.xlu1 %v2411_v40, %s2259_s18  ;;  %v570_v61 = vshrl.u32 %v210_v48, 16  ;;  %v929_v63 = vrot.slane %v927_v57, 4  ;;  %v573_v2 = vshll.u32 %v210_v48, 16  ;;  %v583_v7 = vshrl.u32 %v211_v54, 16 }
  0x45   : > { %v539_v9 = vrot.slane %v538_v34, 4  ;;  %v2635_v11 = vsel %vm2321_vm5, %v2094_v45, %v920_v50  ;;  %343 = vst.msk [vmem:[#allocation2 + $0x48] sm:$0xff] %vm333_vm0, %v2628_v60  ;;  %v579_v3 = vshll.u32 %v211_v54, 16  ;;  %v589_v16 = vshll.u32 %v212_v55, 16 }
  0x46   : > { %v572_v12 = vrot.slane %v570_v61, 4  ;;  %v931_v0 = vsel %vm2321_vm5, %v929_v63, %v930_v58  ;;  %v575_v5 = vrot.slane %v573_v2, 5  ;;  %v585_v15 = vrot.slane %v583_v7, 4  ;;  %v217_v2 = vld [vmem:[%s2301_s17 + $0x88] sm:$0xf] }
  0x47   : > { %1195 = vrot.lane.b32.xlu0 %v2459_v4, %s2263_s24  ;;  %v928_v4 = vsel %vm2321_vm5, %v2095_v53, %v927_v57  ;;  %v922_v19 = vrot.slane %v920_v50, 4  ;;  %v559_v20 = vshrl.u32 %v2576_v32, 16  ;;  %v581_v23 = vrot.slane %v579_v3, 5  ;;  %v215_v50 = vld [vmem:[%s2301_s17 + $0x80] sm:$0x1] }
  0x48   : > { %1197 = vrot.lane.b32.xlu1 %v2591_v39, %s2263_s24  ;;  %v2646_v22 = vcombine.low %v928_v4, %v931_v0  ;;  %v2652_v25 = vrot.slane %v546_v46, 4  ;;  %v576_v10 = vor.u32 %v575_v5, %v572_v12  ;;  %v591_v26 = vrot.slane %v589_v16, 5  ;;  %v2244_v0 = vld [vmem:[%s3239_s1 + $0x10] ss:$0 sps:$4 sm:$0x33]  }
  0x49   : > { %v586_v14 = vor.u32 %v585_v15, %v581_v23  ;;  %v2055_v1 = vcombine.low %v2330_v18, %v2335_v21  ;;  %v2096_v27 = vrot.slane %v210_v48, 9  ;;  %v934_v28 = vrot.slane %v211_v54, 5  ;;  %2212 = vmatprep.subr.msk.bf16.mxu0 %vm1655_vm7, %v2244_v0  ;;  %2213 = vmatprep.subr.msk.bf16.mxu1 %vm1655_vm7, %v2244_v0 }
  0x4a   : > { %v2659_v30 = vrot.slane %v549_v59, 5  ;;  %v555_v6 = vshll.u32 %v2576_v32, 16  ;;  %v577_v33 = vrot.slane %v576_v10, 4  ;;  %v544_v18 = vsel %vm2358_vm6, %v539_v9, %v2612_v49  ;;  %v216_v59 = vld [vmem:[%s2301_s17 + $0x84] sm:$0xf] }
  0x4b   : > { %1271 = vrot.lane.b32.xlu0 %v2479_v24, %s2260_s19  ;;  %v534_v24 = vsel %vm2358_vm6, %v2619_v56, %v2580_v35  ;;  %v937_v35 = vrot.slane %v212_v55, 5  ;;  %v587_v21 = vrot.slane %v586_v14, 4  ;;  %334 = vst.msk [vmem:[#allocation2] sm:$0xff] %vm333_vm0, %v2055_v1  ;;  %v936_v38 = vrot.slane %v934_v28, 4 }
  0x4c   : > { %1273 = vrot.lane.b32.xlu1 %v2594_v41, %s2260_s19  ;;  %v2673_v32 = vsel %vm2321_vm5, %v922_v19, %v923_v51  ;;  %v582_v45 = vsel %vm2358_vm6, %v577_v33, %v581_v23  ;;  %v2677_v48 = vcombine.low %v213_v29, %v214_v36  ;;  %v594_v34 = vshrl.u32 %v213_v29, 16 }
  0x4d   : > { %v592_v49 = vsel %vm2358_vm6, %v587_v21, %v591_v26  ;;  %v938_v54 = vsel %vm2321_vm5, %v936_v38, %v937_v35  ;;  %v597_v56 = vshll.u32 %v213_v29, 16  ;;  %v607_v53 = vshrl.u32 %v214_v36, 16 }
  0x4e   : > { %v2686_v51 = vrot.slane %v559_v20, 4  ;;  %v2688_v57 = vcombine.low %v582_v45, %v592_v49  ;;  %344 = vst.msk [vmem:[#allocation2 + $0x50] sm:$0xff] %vm333_vm0, %v2677_v48  ;;  %v596_v46 = vrot.slane %v594_v34, 4  ;;  %v603_v55 = vshll.u32 %v214_v36, 16  ;;  %v219_v34 = vld [vmem:[%s2301_s17 + $0x90] sm:$0xf] }
  0x4f   : > { %1341 = vrot.lane.b32.xlu0 %v2411_v40, %s2264_s27  ;;  %v935_v40 = vsel %vm2321_vm5, %v2096_v27, %v934_v28  ;;  %v599_v61 = vrot.slane %v597_v56, 5  ;;  %v609_v4 = vrot.slane %v607_v53, 4  ;;  %v613_v63 = vshll.u32 %v215_v50, 16  ;;  %v218_v27 = vld [vmem:[%s2301_s17 + $0x8c] sm:$0x1] }
  0x50   : > { %1343 = vrot.lane.b32.xlu1 %v2454_v8, %s2264_s27  ;;  %v2690_v58 = vcombine.low %v935_v40, %v938_v54  ;;  %v2698_v7 = vcombine.low %v534_v24, %v544_v18  ;;  %v2097_v9 = vrot.slane %v213_v29, 9  ;;  %v941_v12 = vrot.slane %v214_v36, 5  ;;  %v220_v53 = vld [vmem:[%s2301_s17 + $0x94] sm:$0xf] }
  0x51   : > { %v944_v3 = vrot.slane %v215_v50, 5  ;;  %v600_v5 = vor.u32 %v599_v61, %v596_v46  ;;  %v605_v15 = vrot.slane %v603_v55, 5  ;;  %v615_v16 = vrot.slane %v613_v63, 5  ;;  %v221_v63 = vld [vmem:[%s2301_s17 + $0x98] sm:$0x1] }
  0x52   : > { %v2703_v19 = vcombine.low %v216_v59, %v217_v2  ;;  %v942_v20 = vsel %vm2321_vm5, %v2097_v9, %v941_v12  ;;  %v943_v23 = vrot.slane %v941_v12, 4  ;;  %v618_v24 = vshrl.u32 %v216_v59, 16 }
  0x53   : > { %1433 = vrot.lane.b32.xlu0 %v2591_v39, %s2265_s28  ;;  %v621_v10 = vshll.u32 %v216_v59, 16  ;;  %v601_v26 = vrot.slane %v600_v5, 4  ;;  %v610_v14 = vor.u32 %v609_v4, %v605_v15  ;;  %v631_v1 = vshrl.u32 %v217_v2, 16 }
  0x54   : > { %1435 = vrot.lane.b32.xlu1 %v2600_v43, %s2265_s28  ;;  %345 = vst.msk [vmem:[#allocation2 + $0x58] sm:$0xff] %vm333_vm0, %v2703_v19  ;;  %v2714_v28 = vrot.slane %v555_v6, 5  ;;  %v945_v29 = vsel %vm2321_vm5, %v943_v23, %v944_v3  ;;  %v1657_v33 = vsel %vm1655_vm7, %v2244_v0, 0  ;;  %v620_v35 = vrot.slane %v618_v24, 4 }
  0x55   : > { %v611_v36 = vrot.slane %v610_v14, 4  ;;  %v2720_v18 = vcombine.low %v942_v20, %v945_v29  ;;  %2173 = vmatpush3.bf16.msra.mxu0 %v1657_v33  ;;  %v623_v21 = vrot.slane %v621_v10, 5  ;;  %2211 = vmatpush3.bf16.msra.mxu1 %v1657_v33  ;;  %v627_v6 = vshll.u32 %v217_v2, 16 }
  0x56   : > { %v633_v40 = vrot.slane %v631_v1, 4  ;;  %v637_v38 = vshll.u32 %v218_v27, 16  ;;  %v2098_v45 = vrot.slane %v216_v59, 9  ;;  %v948_v54 = vrot.slane %v217_v2, 5  ;;  %v222_v1 = vld [vmem:[%s2301_s17 + $0x9c] sm:$0xf] }
  0x57   : > { %1509 = vrot.lane.b32.xlu0 %v2594_v41, %s2266_s29  ;;  %v616_v50 = vsel %vm2358_vm6, %v611_v36, %v615_v16  ;;  %v624_v49 = vor.u32 %v623_v21, %v620_v35  ;;  %v951_v56 = vrot.slane %v218_v27, 5  ;;  %v629_v61 = vrot.slane %v627_v6, 5 }
  0x58   : > { %793 = vrot.lane.b32.xlu1 %v2591_v39, %s2262_s21  ;;  %v606_v39 = vsel %vm2358_vm6, %v601_v26, %v605_v15  ;;  %v639_v55 = vrot.slane %v637_v38, 5  ;;  %v2732_v4 = vcombine.low %v219_v34, %v220_v53  ;;  %v949_v59 = vsel %vm2321_vm5, %v2098_v45, %v948_v54  ;;  %v224_v38 = vld [vmem:[%s2301_s17 + $0xa4] sm:$0x1] }
  0x59   : > { %v2730_v46 = vcombine.low %v606_v39, %v616_v50  ;;  %v625_v9 = vrot.slane %v624_v49, 4  ;;  %v950_v12 = vrot.slane %v948_v54, 4  ;;  %v642_v3 = vshrl.u32 %v219_v34, 16  ;;  %v223_v39 = vld [vmem:[%s2301_s17 + $0xa0] sm:$0xf] }
  0x5a   : > { %v634_v2 = vor.u32 %v633_v40, %v629_v61  ;;  %v645_v0 = vshll.u32 %v219_v34, 16  ;;  %v655_v5 = vshrl.u32 %v220_v53, 16  ;;  %346 = vst.msk [vmem:[#allocation2 + $0x60] sm:$0xff] %vm333_vm0, %v2732_v4  ;;  %v651_v15 = vshll.u32 %v220_v53, 16 }
  0x5b   : > { %1511 = vrot.lane.b32.xlu0 %v2596_v42, %s2266_s29  ;;  %v630_v16 = vsel %vm2358_vm6, %v625_v9, %v629_v61  ;;  %v952_v20 = vsel %vm2321_vm5, %v950_v12, %v951_v56  ;;  %v644_v23 = vrot.slane %v642_v3, 4  ;;  %v661_v24 = vshll.u32 %v221_v63, 16 }
  0x5c   : > { %795 = vrot.lane.b32.xlu1 %v2600_v43, %s2262_s21  ;;  %v2747_v10 = vcombine.low %v949_v59, %v952_v20  ;;  %v647_v26 = vrot.slane %v645_v0, 5  ;;  %v653_v14 = vrot.slane %v651_v15, 5  ;;  %v657_v27 = vrot.slane %v655_v5, 4  ;;  %v225_v0 = vld [vmem:[%s2301_s17 + $0xa8] sm:$0xf] }
  0x5d   : > { %v663_v29 = vrot.slane %v661_v24, 5  ;;  %v2099_v33 = vrot.slane %v219_v34, 9  ;;  %v955_v35 = vrot.slane %v220_v53, 5  ;;  %v958_v6 = vrot.slane %v221_v63, 5 }
  0x5e   : > { %v648_v21 = vor.u32 %v647_v26, %v644_v23  ;;  %v2755_v40 = vcombine.low %v222_v1, %v223_v39  ;;  %v658_v50 = vor.u32 %v657_v27, %v653_v14  ;;  %v666_v54 = vshrl.u32 %v222_v1, 16  ;;  %v226_v26 = vld [vmem:[%s2301_s17 + $0xac] sm:$0xf] }
  0x5f   : > { %1037 = vrot.lane.b32.xlu0 %v2594_v41, %s2261_s20  ;;  %v635_v41 = vrot.slane %v634_v2, 4  ;;  %v956_v34 = vsel %vm2321_vm5, %v2099_v33, %v955_v35  ;;  %v957_v49 = vrot.slane %v955_v35, 4  ;;  %v669_v56 = vshll.u32 %v222_v1, 16 }
  0x60   : > { %1039 = vrot.lane.b32.xlu1 %v2596_v42, %s2261_s20  ;;  %v679_v53 = vshrl.u32 %v223_v39, 16  ;;  %347 = vst.msk [vmem:[#allocation2 + $0x68] sm:$0xff] %vm333_vm0, %v2755_v40  ;;  %v659_v61 = vrot.slane %v658_v50, 4  ;;  %v675_v63 = vshll.u32 %v223_v39, 16  ;;  %v685_v9 = vshll.u32 %v224_v38, 16 }
  0x61   : > { %v640_v36 = vsel %vm2358_vm6, %v635_v41, %v639_v55  ;;  %v959_v55 = vsel %vm2321_vm5, %v957_v49, %v958_v6  ;;  %v668_v3 = vrot.slane %v666_v54, 4  ;;  %v671_v2 = vrot.slane %v669_v56, 5 }
  0x62   : > { %v2760_v45 = vcombine.low %v630_v16, %v640_v36  ;;  %v2772_v12 = vcombine.low %v956_v34, %v959_v55  ;;  %v664_v5 = vsel %vm2358_vm6, %v659_v61, %v663_v29  ;;  %v677_v15 = vrot.slane %v675_v63, 5  ;;  %v227_v36 = vld [vmem:[%s2301_s17 + $0xb0] sm:$0x1]  ;;  %v228_v63 = vld [vmem:[%s2301_s17 + $0xb4] sm:$0xf] }
  0x63   : > { %1107 = vrot.lane.b32.xlu0 %v2454_v8, %s2259_s18  ;;  %v649_v8 = vrot.slane %v648_v21, 4  ;;  %v681_v16 = vrot.slane %v679_v53, 4  ;;  %v687_v20 = vrot.slane %v685_v9, 5  ;;  %v2100_v24 = vrot.slane %v222_v1, 9  ;;  %v229_v9 = vld [vmem:[%s2301_s17 + $0xb8] sm:$0xf] }
  0x64   : > { %1109 = vrot.lane.b32.xlu1 %v2495_v31, %s2259_s18  ;;  %v962_v41 = vrot.slane %v223_v39, 5  ;;  %v965_v27 = vrot.slane %v224_v38, 5  ;;  %v2782_v33 = vcombine.low %v225_v0, %v226_v26  ;;  %v690_v35 = vshrl.u32 %v225_v0, 16 }
  0x65   : > { %v654_v59 = vsel %vm2358_vm6, %v649_v8, %v653_v14  ;;  %v682_v14 = vor.u32 %v681_v16, %v677_v15  ;;  %v693_v50 = vshll.u32 %v225_v0, 16  ;;  %v703_v39 = vshrl.u32 %v226_v26, 16 }
  0x66   : > { %v2779_v23 = vcombine.low %v654_v59, %v664_v5  ;;  %v963_v29 = vsel %vm2321_vm5, %v2100_v24, %v962_v41  ;;  %v964_v6 = vrot.slane %v962_v41, 4  ;;  %348 = vst.msk [vmem:[#allocation2 + $0x70] sm:$0xff] %vm333_vm0, %v2782_v33  ;;  %v692_v38 = vrot.slane %v690_v35, 4  ;;  %v230_v35 = vld [vmem:[%s2301_s17 + $0xbc] sm:$0x1] }
  0x67   : > { %1199 = vrot.lane.b32.xlu0 %v2600_v43, %s2263_s24  ;;  %v672_v43 = vor.u32 %v671_v2, %v668_v3  ;;  %v683_v1 = vrot.slane %v682_v14, 4  ;;  %v699_v34 = vshll.u32 %v226_v26, 16  ;;  %v695_v8 = vrot.slane %v693_v50, 5 }
  0x68   : > { %1201 = vrot.lane.b32.xlu1 %v2602_v44, %s2263_s24  ;;  %v966_v49 = vsel %vm2321_vm5, %v964_v6, %v965_v27  ;;  %v709_v54 = vshll.u32 %v227_v36, 16  ;;  %v705_v55 = vrot.slane %v703_v39, 4  ;;  %v2101_v5 = vrot.slane %v225_v0, 9 }
  0x69   : > { %v673_v21 = vrot.slane %v672_v43, 4  ;;  %v688_v56 = vsel %vm2358_vm6, %v683_v1, %v687_v20  ;;  %v2799_v53 = vcombine.low %v963_v29, %v966_v49  ;;  %v701_v61 = vrot.slane %v699_v34, 5 }
  0x6a   : > { %v696_v3 = vor.u32 %v695_v8, %v692_v38  ;;  %v711_v2 = vrot.slane %v709_v54, 5  ;;  %v969_v16 = vrot.slane %v226_v26, 5  ;;  %v972_v20 = vrot.slane %v227_v36, 5 }
  0x6b   : > { %1275 = vrot.lane.b32.xlu0 %v2596_v42, %s2260_s19  ;;  %v678_v42 = vsel %vm2358_vm6, %v673_v21, %v677_v15  ;;  %v706_v15 = vor.u32 %v705_v55, %v701_v61  ;;  %v2809_v43 = vcombine.low %v228_v63, %v229_v9  ;;  %v714_v41 = vshrl.u32 %v228_v63, 16 }
  0x6c   : > { %1277 = vrot.lane.b32.xlu1 %v2604_v17, %s2260_s19  ;;  %v2805_v59 = vcombine.low %v678_v42, %v688_v56  ;;  %v697_v24 = vrot.slane %v696_v3, 4  ;;  %v717_v14 = vshll.u32 %v228_v63, 16  ;;  %v727_v27 = vshrl.u32 %v229_v9, 16 }
  0x6d   : > { %v707_v21 = vrot.slane %v706_v15, 4  ;;  %v971_v29 = vrot.slane %v969_v16, 4  ;;  %349 = vst.msk [vmem:[#allocation2 + $0x78] sm:$0xff] %vm333_vm0, %v2809_v43  ;;  %v723_v0 = vshll.u32 %v229_v9, 16  ;;  %v716_v36 = vrot.slane %v714_v41, 4 }
  0x6e   : > { %v702_v26 = vsel %vm2358_vm6, %v697_v24, %v701_v61  ;;  %v719_v6 = vrot.slane %v717_v14, 5  ;;  %v729_v50 = vrot.slane %v727_v27, 4  ;;  %v733_v34 = vshll.u32 %v230_v35, 16 }
  0x6f   : > { %1345 = vrot.lane.b32.xlu0 %v2495_v31, %s2264_s27  ;;  %v970_v31 = vsel %vm2321_vm5, %v2101_v5, %v969_v16  ;;  %v712_v1 = vsel %vm2358_vm6, %v707_v21, %v711_v2  ;;  %v973_v39 = vsel %vm2321_vm5, %v971_v29, %v972_v20  ;;  %v725_v38 = vrot.slane %v723_v0, 5 }
  0x70   : > { %1347 = vrot.lane.b32.xlu1 %v2530_v62, %s2264_s27  ;;  %v2826_v42 = vcombine.low %v702_v26, %v712_v1  ;;  %v2828_v49 = vcombine.low %v970_v31, %v973_v39  ;;  %v720_v8 = vor.u32 %v719_v6, %v716_v36  ;;  %v976_v54 = vrot.slane %v229_v9, 5 }
  0x71   : > { %v2110_v56 = vcombine.low %v2635_v11, %v2673_v32  ;;  %v730_v61 = vor.u32 %v729_v50, %v725_v38  ;;  %v735_v55 = vrot.slane %v733_v34, 5  ;;  %v2102_v2 = vrot.slane %v228_v63, 9 }
  0x72   : > { %v721_v3 = vrot.slane %v720_v8, 4  ;;  %v978_v5 = vrot.slane %v976_v54, 4  ;;  %v979_v15 = vrot.slane %v230_v35, 5  ;;  %v552_v16 = vor.u32 %v2659_v30, %v2652_v25 }
  0x73   : > { %1437 = vrot.lane.b32.xlu0 %v2602_v44, %s2265_s28  ;;  %v565_v9 = vshll.u32 %v2608_v47, 16  ;;  %v731_v20 = vrot.slane %v730_v61, 4  ;;  %v562_v11 = vor.u32 %v2686_v51, %v2714_v28  ;;  %v977_v63 = vsel %vm2321_vm5, %v2102_v2, %v976_v54 }
  0x74   : > { %1439 = vrot.lane.b32.xlu1 %v2698_v7, %s2265_s28  ;;  %v726_v32 = vsel %vm2358_vm6, %v721_v3, %v725_v38  ;;  %v980_v24 = vsel %vm2321_vm5, %v978_v5, %v979_v15  ;;  %v553_v25 = vrot.slane %v552_v16, 4  ;;  %vm1606_vm0 = vcmask 293888  }
  0x75   : > { %v2849_v41 = vcombine.low %v977_v63, %v980_v24  ;;  %v563_v30 = vrot.slane %v562_v11, 4  ;;  %v567_v51 = vrot.slane %v565_v9, 5 }
  0x76   : > { %v558_v14 = vsel %vm2358_vm6, %v553_v25, %v2714_v28 }
  0x77   : > { %1513 = vrot.lane.b32.xlu0 %v2604_v17, %s2266_s29  ;;  %v568_v27 = vsel %vm2358_vm6, %v563_v30, %v567_v51 }
  0x78   : > { %797 = vrot.lane.b32.xlu1 %v2602_v44, %s2262_s21  ;;  %v736_v44 = vsel %vm2358_vm6, %v731_v20, %v735_v55  ;;  %v2079_v35 = vcombine.low %v558_v14, %v568_v27  ;;  %v3021_v27 = vld [vmem:[%s2301_s17 + $0xc0] sm:$0xf] }
  0x79   : > { %v2852_v47 = vcombine.low %v726_v32, %v736_v44 }
  0x7b   : > { %1515 = vrot.lane.b32.xlu0 %v2110_v56, %s2266_s29 }
  0x7c   : > { %799 = vrot.lane.b32.xlu1 %v2698_v7, %s2262_s21 }
  0x7f   : > { %1041 = vrot.lane.b32.xlu0 %v2604_v17, %s2261_s20 }
  0x80   : > { %1043 = vrot.lane.b32.xlu1 %v2110_v56, %s2261_s20 }
  0x83   : > { %1111 = vrot.lane.b32.xlu0 %v2530_v62, %s2259_s18 }
  0x84   : > { %1113 = vrot.lane.b32.xlu1 %v2585_v37, %s2259_s18 }
  0x86   : > { %v1102_v21 = vpop.permute.xlu1 %1101 }
  0x87   : > { %1203 = vrot.lane.b32.xlu0 %v2698_v7, %s2263_s24  ;;  %v1100_v17 = vpop.permute.xlu0 %1099 }
  0x88   : > { %1205 = vrot.lane.b32.xlu1 %v2079_v35, %s2263_s24 }
  0x8b   : > { %1279 = vrot.lane.b32.xlu0 %v2110_v56, %s2260_s19 }
  0x8c   : > { %1281 = vrot.lane.b32.xlu1 %v2646_v22, %s2260_s19 }
  0x8d   : > { %v1268_v62 = vpop.permute.xlu0 %1267 }
  0x8f   : > { %1349 = vrot.lane.b32.xlu0 %v2585_v37, %s2264_s27 }
  0x90   : > { %1351 = vrot.lane.b32.xlu1 %v2628_v60, %s2264_s27  ;;  %v1030_v28 = vpop.permute.xlu1 %1029 }
  0x93   : > { %1441 = vrot.lane.b32.xlu0 %v2079_v35, %s2265_s28 }
  0x94   : > { %1443 = vrot.lane.b32.xlu1 %v2688_v57, %s2265_s28  ;;  %v1032_v7 = vpop.permute.xlu1 %1031 }
  0x95   : > { %v786_v31 = vpop.permute.xlu0 %785 }
  0x96   : > { %834 = vst.msk [vmem:[#allocation2] sm:$0xff] %vm833_vm8, %v786_v31 }
  0x97   : > { %1078 = vst.msk [vmem:[#allocation2] sm:$0xff] %vm1077_vm9, %v1030_v28  ;;  %1517 = vrot.lane.b32.xlu0 %v2646_v22, %s2266_s29 }
  0x98   : > { %801 = vrot.lane.b32.xlu1 %v2079_v35, %s2262_s21  ;;  %v1270_v37 = vpop.permute.xlu1 %1269  ;;  %1148 = vst.msk [vmem:[#allocation2] sm:$0xff] %vm1147_vm10, %v1100_v17  ;;  %v3024_v17 = vld [vmem:[%s2301_s17 + $0xc4] sm:$0xf] }
  0x99   : > { %v788_v29 = vpop.permute.xlu0 %787  ;;  %v1174_v28 = vshll.u32 %v3024_v17, 16 }
  0x9a   : > { %835 = vst.msk [vmem:[#allocation2 + $0x8] sm:$0xff] %vm833_vm8, %v788_v29 }
  0x9b   : > { %1079 = vst.msk [vmem:[#allocation2 + $0x8] sm:$0xff] %vm1077_vm9, %v1032_v7  ;;  %1519 = vrot.lane.b32.xlu0 %v2690_v58, %s2266_s29 }
  0x9c   : > { %803 = vrot.lane.b32.xlu1 %v2688_v57, %s2262_s21  ;;  %1149 = vst.msk [vmem:[#allocation2 + $0x8] sm:$0xff] %vm1147_vm10, %v1102_v21  ;;  %v1165_v21 = vshrl.u32 %v3021_v27, 16 }
  0x9d   : > { %v1192_v0 = vpop.permute.xlu0 %1191 }
  0x9e   : > { %v1194_v26 = vpop.permute.xlu1 %1193  ;;  %1240 = vst.msk [vmem:[#allocation2] sm:$0xff] %vm1239_vm11, %v1192_v0  ;;  %v1176_v0 = vrot.slane %v1174_v28, 5 }
  0x9f   : > { %1241 = vst.msk [vmem:[#allocation2 + $0x8] sm:$0xff] %vm1239_vm11, %v1194_v26  ;;  %1045 = vrot.lane.b32.xlu0 %v2646_v22, %s2261_s20 }
  0xa0   : > { %1316 = vst.msk [vmem:[#allocation2] sm:$0xff] %vm1315_vm12, %v1268_v62  ;;  %1047 = vrot.lane.b32.xlu1 %v2690_v58, %s2261_s20  ;;  %1317 = vst.msk [vmem:[#allocation2 + $0x8] sm:$0xff] %vm1315_vm12, %v1270_v37  ;;  %v1178_v62 = vshrl.u32 %v3024_v17, 16 }
  0xa1   : > { %v1338_v36 = vpop.permute.xlu0 %1337 }
  0xa2   : > { %1386 = vst.msk [vmem:[#allocation2] sm:$0xff] %vm1385_vm13, %v1338_v36  ;;  %v1340_v6 = vpop.permute.xlu1 %1339  ;;  %v1180_v26 = vrot.slane %v1178_v62, 4 }
  0xa3   : > { %1387 = vst.msk [vmem:[#allocation2 + $0x8] sm:$0xff] %vm1385_vm13, %v1340_v6  ;;  %1115 = vrot.lane.b32.xlu0 %v2628_v60, %s2259_s18 }
  0xa4   : > { %1117 = vrot.lane.b32.xlu1 %v2677_v48, %s2259_s18 }
  0xa5   : > { %v1430_v22 = vpop.permute.xlu0 %1429 }
  0xa6   : > { %1478 = vst.msk [vmem:[#allocation2] sm:$0xff] %vm1477_vm14, %v1430_v22  ;;  %v1432_v50 = vpop.permute.xlu1 %1431  ;;  %v233_v22 = vld [vmem:[%s2301_s17 + $0xc8] sm:$0x1] }
  0xa7   : > { %1479 = vst.msk [vmem:[#allocation2 + $0x8] sm:$0xff] %vm1477_vm14, %v1432_v50  ;;  %1207 = vrot.lane.b32.xlu0 %v2688_v57, %s2263_s24 }
  0xa8   : > { %1209 = vrot.lane.b32.xlu1 %v2730_v46, %s2263_s24 }
  0xa9   : > { %v1506_v1 = vpop.permute.xlu0 %1505 }
  0xaa   : > { %1554 = vst.msk [vmem:[#allocation2] sm:$0xff] %vm1553_vm15, %v1506_v1  ;;  %v790_v60 = vpop.permute.xlu1 %789 }
  0xab   : > { %836 = vst.msk [vmem:[#allocation2 + $0x10] sm:$0xff] %vm833_vm8, %v790_v60  ;;  %1283 = vrot.lane.b32.xlu0 %v2690_v58, %s2260_s19  ;;  %v1181_v60 = vor.u32 %v1180_v26, %v1176_v0 }
  0xac   : > { %1285 = vrot.lane.b32.xlu1 %v2720_v18, %s2260_s19 }
  0xad   : > { %v1508_v39 = vpop.permute.xlu0 %1507 }
  0xae   : > { %1555 = vst.msk [vmem:[#allocation2 + $0x8] sm:$0xff] %vm1553_vm15, %v1508_v39  ;;  %v792_v57 = vpop.permute.xlu1 %791  ;;  %v1184_v39 = vshll.u32 %v233_v22, 16 }
  0xaf   : > { %837 = vst.msk [vmem:[#allocation2 + $0x18] sm:$0xff] %vm833_vm8, %v792_v57  ;;  %1353 = vrot.lane.b32.xlu0 %v2677_v48, %s2264_s27 }
  0xb0   : > { %1355 = vrot.lane.b32.xlu1 %v2703_v19, %s2264_s27 }
  0xb1   : > { %v1034_v38 = vpop.permute.xlu0 %1033  ;;  %v1570_v34 = vld [vmem:[#allocation2] sm:$0xff] }
  0xb2   : > { %1080 = vst.msk [vmem:[#allocation2 + $0x10] sm:$0xff] %vm1077_vm9, %v1034_v38  ;;  %v1036_v58 = vpop.permute.xlu1 %1035  ;;  %2174 = vmatprep.mubr.msk.bf16.mxu0 %vm1606_vm0, %v1570_v34  ;;  %v3052_v38 = vld [vmem:[%s2301_s17 + $0xcc] sm:$0xf] }
  0xb3   : > { %1081 = vst.msk [vmem:[#allocation2 + $0x18] sm:$0xff] %vm1077_vm9, %v1036_v58  ;;  %1445 = vrot.lane.b32.xlu0 %v2730_v46, %s2265_s28  ;;  %v3056_v58 = vld [vmem:[%s2301_s17 + $0xd0] sm:$0xf]  ;;  %v2125_v28 = vrot.slane %v3052_v38, 9 }
  0xb4   : > { %1447 = vrot.lane.b32.xlu1 %v2760_v45, %s2265_s28 }
  0xb5   : > { %v1104_v48 = vpop.permute.xlu0 %1103  ;;  %v1571_v8 = vld [vmem:[#allocation2 + $0x8] sm:$0xff] }
  0xb6   : > { %1150 = vst.msk [vmem:[#allocation2 + $0x10] sm:$0xff] %vm1147_vm10, %v1104_v48  ;;  %v1106_v54 = vpop.permute.xlu1 %1105  ;;  %2175 = vmatmul.mubr.msk.bf16.vlgmr.msra.gmra.mrb[0].mxu0 %vm1606_vm0, %v1571_v8  ;;  %v1186_v8 = vrot.slane %v1184_v39, 5 }
  0xb7   : > { %1151 = vst.msk [vmem:[#allocation2 + $0x18] sm:$0xff] %vm1147_vm10, %v1106_v54  ;;  %1521 = vrot.lane.b32.xlu0 %v2720_v18, %s2266_s29  ;;  %v1403_v54 = vshrl.u32 %v3052_v38, 16 }
  0xb8   : > { %805 = vrot.lane.b32.xlu1 %v2730_v46, %s2262_s21 }
  0xb9   : > { %v1196_v56 = vpop.permute.xlu0 %1195 }
  0xba   : > { %1242 = vst.msk [vmem:[#allocation2 + $0x10] sm:$0xff] %vm1239_vm11, %v1196_v56  ;;  %v1198_v61 = vpop.permute.xlu1 %1197  ;;  %v1406_v56 = vshll.u32 %v3052_v38, 16 }
  0xbb   : > { %1243 = vst.msk [vmem:[#allocation2 + $0x18] sm:$0xff] %vm1239_vm11, %v1198_v61  ;;  %1523 = vrot.lane.b32.xlu0 %v2747_v10, %s2266_s29 }
  0xbc   : > { %807 = vrot.lane.b32.xlu1 %v2760_v45, %s2262_s21 }
  0xbd   : > { %v1272_v55 = vpop.permute.xlu0 %1271 }
  0xbe   : > { %1318 = vst.msk [vmem:[#allocation2 + $0x10] sm:$0xff] %vm1315_vm12, %v1272_v55  ;;  %v1274_v3 = vpop.permute.xlu1 %1273  ;;  %v1259_v55 = vrot.slane %v3024_v17, 5 }
  0xbf   : > { %1319 = vst.msk [vmem:[#allocation2 + $0x18] sm:$0xff] %vm1315_vm12, %v1274_v3  ;;  %1049 = vrot.lane.b32.xlu0 %v2720_v18, %s2261_s20  ;;  %v1416_v3 = vshrl.u32 %v3056_v58, 16 }
  0xc0   : > { %1051 = vrot.lane.b32.xlu1 %v2747_v10, %s2261_s20 }
  0xc1   : > { %v1342_v46 = vpop.permute.xlu0 %1341 }
  0xc2   : > { %1388 = vst.msk [vmem:[#allocation2 + $0x10] sm:$0xff] %vm1385_vm13, %v1342_v46  ;;  %v1344_v2 = vpop.permute.xlu1 %1343  ;;  %v1412_v46 = vshll.u32 %v3056_v58, 16 }
  0xc3   : > { %1389 = vst.msk [vmem:[#allocation2 + $0x18] sm:$0xff] %vm1385_vm13, %v1344_v2  ;;  %1119 = vrot.lane.b32.xlu0 %v2703_v19, %s2259_s18 }
  0xc4   : > { %1121 = vrot.lane.b32.xlu1 %v2732_v4, %s2259_s18 }
  0xc5   : > { %v1434_v5 = vpop.permute.xlu0 %1433 }
  0xc6   : > { %1480 = vst.msk [vmem:[#allocation2 + $0x10] sm:$0xff] %vm1477_vm14, %v1434_v5  ;;  %v1436_v15 = vpop.permute.xlu1 %1435  ;;  %v2119_v5 = vcombine.low %v3021_v27, %v3024_v17  ;;  %v1497_v17 = vrot.slane %v3056_v58, 5 }
  0xc7   : > { %1481 = vst.msk [vmem:[#allocation2 + $0x18] sm:$0xff] %vm1477_vm14, %v1436_v15  ;;  %1211 = vrot.lane.b32.xlu0 %v2760_v45, %s2263_s24 }
  0xc8   : > { %1213 = vrot.lane.b32.xlu1 %v2779_v23, %s2263_s24  ;;  %v1498_v52 = vsel %vm2321_vm5, %v2125_v28, %v1497_v17 }
  0xc9   : > { %v1510_v18 = vpop.permute.xlu0 %1509 }
  0xca   : > { %1556 = vst.msk [vmem:[#allocation2 + $0x10] sm:$0xff] %vm1553_vm15, %v1510_v18  ;;  %v794_v16 = vpop.permute.xlu1 %793 }
  0xcb   : > { %838 = vst.msk [vmem:[#allocation2 + $0x20] sm:$0xff] %vm833_vm8, %v794_v16  ;;  %1287 = vrot.lane.b32.xlu0 %v2747_v10, %s2260_s19  ;;  %v2121_v16 = vrot.slane %v3021_v27, 9 }
  0xcc   : > { %1289 = vrot.lane.b32.xlu1 %v2772_v12, %s2260_s19 }
  0xcd   : > { %v1512_v19 = vpop.permute.xlu0 %1511 }
  0xce   : > { %1557 = vst.msk [vmem:[#allocation2 + $0x18] sm:$0xff] %vm1553_vm15, %v1512_v19  ;;  %v796_v9 = vpop.permute.xlu1 %795  ;;  %v1405_v19 = vrot.slane %v1403_v54, 4 }
  0xcf   : > { %839 = vst.msk [vmem:[#allocation2 + $0x28] sm:$0xff] %vm833_vm8, %v796_v9  ;;  %1357 = vrot.lane.b32.xlu0 %v2732_v4, %s2264_s27  ;;  %v1408_v9 = vrot.slane %v1406_v56, 5 }
  0xd0   : > { %1359 = vrot.lane.b32.xlu1 %v2755_v40, %s2264_s27 }
  0xd1   : > { %v1038_v45 = vpop.permute.xlu0 %1037  ;;  %v1572_v20 = vld [vmem:[#allocation2 + $0x10] sm:$0xff] }
  0xd2   : > { %1082 = vst.msk [vmem:[#allocation2 + $0x20] sm:$0xff] %vm1077_vm9, %v1038_v45  ;;  %v1040_v10 = vpop.permute.xlu1 %1039  ;;  %2178 = vmatprep.mubr.msk.bf16.mxu0 %vm1606_vm0, %v1572_v20  ;;  %v1261_v20 = vrot.slane %v1259_v55, 4 }
  0xd3   : > { %1083 = vst.msk [vmem:[#allocation2 + $0x28] sm:$0xff] %vm1077_vm9, %v1040_v10  ;;  %1449 = vrot.lane.b32.xlu0 %v2779_v23, %s2265_s28  ;;  %v1262_v10 = vrot.slane %v233_v22, 5 }
  0xd4   : > { %1451 = vrot.lane.b32.xlu1 %v2805_v59, %s2265_s28 }
  0xd5   : > { %v1108_v11 = vpop.permute.xlu0 %1107  ;;  %v1573_v4 = vld [vmem:[#allocation2 + $0x18] sm:$0xff] }
  0xd6   : > { %1152 = vst.msk [vmem:[#allocation2 + $0x20] sm:$0xff] %vm1147_vm10, %v1108_v11  ;;  %v1110_v32 = vpop.permute.xlu1 %1109  ;;  %2179 = vmatmul.mubr.msk.bf16.gmra.mrb[4].mxu0 %vm1606_vm0, %v1573_v4  ;;  %v1418_v11 = vrot.slane %v1416_v3, 4 }
  0xd7   : > { %1153 = vst.msk [vmem:[#allocation2 + $0x28] sm:$0xff] %vm1147_vm10, %v1110_v32  ;;  %1525 = vrot.lane.b32.xlu0 %v2772_v12, %s2266_s29  ;;  %v236_v32 = vld [vmem:[%s2301_s17 + $0xd4] sm:$0x1] }
  0xd8   : > { %809 = vrot.lane.b32.xlu1 %v2779_v23, %s2262_s21 }
  0xd9   : > { %v1200_v63 = vpop.permute.xlu0 %1199 }
  0xda   : > { %1244 = vst.msk [vmem:[#allocation2 + $0x20] sm:$0xff] %vm1239_vm11, %v1200_v63  ;;  %v1202_v24 = vpop.permute.xlu1 %1201 }
  0xdb   : > { %1245 = vst.msk [vmem:[#allocation2 + $0x28] sm:$0xff] %vm1239_vm11, %v1202_v24  ;;  %1527 = vrot.lane.b32.xlu0 %v2799_v53, %s2266_s29  ;;  %v1409_v24 = vor.u32 %v1408_v9, %v1405_v19 }
  0xdc   : > { %811 = vrot.lane.b32.xlu1 %v2805_v59, %s2262_s21 }
  0xdd   : > { %v1276_v44 = vpop.permute.xlu0 %1275 }
  0xde   : > { %1320 = vst.msk [vmem:[#allocation2 + $0x20] sm:$0xff] %vm1315_vm12, %v1276_v44  ;;  %v1278_v25 = vpop.permute.xlu1 %1277 }
  0xdf   : > { %1321 = vst.msk [vmem:[#allocation2 + $0x28] sm:$0xff] %vm1315_vm12, %v1278_v25  ;;  %1053 = vrot.lane.b32.xlu0 %v2772_v12, %s2261_s20  ;;  %v1260_v25 = vsel %vm2321_vm5, %v2121_v16, %v1259_v55 }
  0xe0   : > { %1055 = vrot.lane.b32.xlu1 %v2799_v53, %s2261_s20 }
  0xe1   : > { %v1346_v23 = vpop.permute.xlu0 %1345 }
  0xe2   : > { %1390 = vst.msk [vmem:[#allocation2 + $0x20] sm:$0xff] %vm1385_vm13, %v1346_v23  ;;  %v1348_v30 = vpop.permute.xlu1 %1347  ;;  %v1263_v23 = vsel %vm2321_vm5, %v1261_v20, %v1262_v10 }
  0xe3   : > { %1391 = vst.msk [vmem:[#allocation2 + $0x28] sm:$0xff] %vm1385_vm13, %v1348_v30  ;;  %1123 = vrot.lane.b32.xlu0 %v2755_v40, %s2259_s18 }
  0xe4   : > { %1125 = vrot.lane.b32.xlu1 %v2782_v33, %s2259_s18 }
  0xe5   : > { %v1438_v51 = vpop.permute.xlu0 %1437 }
  0xe6   : > { %1482 = vst.msk [vmem:[#allocation2 + $0x20] sm:$0xff] %vm1477_vm14, %v1438_v51  ;;  %v1440_v12 = vpop.permute.xlu1 %1439  ;;  %v1422_v51 = vshll.u32 %v236_v32, 16 }
  0xe7   : > { %1483 = vst.msk [vmem:[#allocation2 + $0x28] sm:$0xff] %vm1477_vm14, %v1440_v12  ;;  %1215 = vrot.lane.b32.xlu0 %v2805_v59, %s2263_s24 }
  0xe8   : > { %1217 = vrot.lane.b32.xlu1 %v2826_v42, %s2263_s24 }
  0xe9   : > { %v1514_v14 = vpop.permute.xlu0 %1513 }
  0xea   : > { %1558 = vst.msk [vmem:[#allocation2 + $0x20] sm:$0xff] %vm1553_vm15, %v1514_v14  ;;  %v798_v40 = vpop.permute.xlu1 %797  ;;  %v1410_v14 = vrot.slane %v1409_v24, 4 }
  0xeb   : > { %840 = vst.msk [vmem:[#allocation2 + $0x30] sm:$0xff] %vm833_vm8, %v798_v40  ;;  %1291 = vrot.lane.b32.xlu0 %v2799_v53, %s2260_s19  ;;  %v1168_v53 = vshll.u32 %v3021_v27, 16 }
  0xec   : > { %1293 = vrot.lane.b32.xlu1 %v2828_v49, %s2260_s19 }
  0xed   : > { %v1516_v35 = vpop.permute.xlu0 %1515  ;;  %v1170_v29 = vrot.slane %v1168_v53, 5 }
  0xee   : > { %1559 = vst.msk [vmem:[#allocation2 + $0x28] sm:$0xff] %vm1553_vm15, %v1516_v35  ;;  %v800_v59 = vpop.permute.xlu1 %799  ;;  %v1424_v35 = vrot.slane %v1422_v51, 5 }
  0xef   : > { %841 = vst.msk [vmem:[#allocation2 + $0x38] sm:$0xff] %vm833_vm8, %v800_v59  ;;  %1361 = vrot.lane.b32.xlu0 %v2782_v33, %s2264_s27  ;;  %v1167_v33 = vrot.slane %v1165_v21, 4 }
  0xf0   : > { %1363 = vrot.lane.b32.xlu1 %v2809_v43, %s2264_s27 }
  0xf1   : > { %v1042_v7 = vpop.permute.xlu0 %1041  ;;  %v1574_v31 = vld [vmem:[#allocation2 + $0x20] sm:$0xff]  ;;  %v1171_v1 = vor.u32 %v1170_v29, %v1167_v33 }
  0xf2   : > { %1084 = vst.msk [vmem:[#allocation2 + $0x30] sm:$0xff] %vm1077_vm9, %v1042_v7  ;;  %v1044_v37 = vpop.permute.xlu1 %1043  ;;  %2182 = vmatprep.mubr.msk.bf16.mxu0 %vm1606_vm0, %v1574_v31  ;;  %v1499_v7 = vrot.slane %v1497_v17, 4  ;;  %v1500_v31 = vrot.slane %v236_v32, 5 }
  0xf3   : > { %1085 = vst.msk [vmem:[#allocation2 + $0x38] sm:$0xff] %vm1077_vm9, %v1044_v37  ;;  %1453 = vrot.lane.b32.xlu0 %v2826_v42, %s2265_s28  ;;  %v1172_v48 = vrot.slane %v1171_v1, 4 }
  0xf4   : > { %1455 = vrot.lane.b32.xlu1 %v2852_v47, %s2265_s28 }
  0xf5   : > { %v1112_v36 = vpop.permute.xlu0 %1111  ;;  %v1575_v6 = vld [vmem:[#allocation2 + $0x28] sm:$0xff]  ;;  %v1177_v15 = vsel %vm2358_vm6, %v1172_v48, %v1176_v0  ;;  %v1501_v0 = vsel %vm2321_vm5, %v1499_v7, %v1500_v31 }
  0xf6   : > { %1154 = vst.msk [vmem:[#allocation2 + $0x30] sm:$0xff] %vm1147_vm10, %v1112_v36  ;;  %v1114_v50 = vpop.permute.xlu1 %1113  ;;  %2183 = vmatmul.mubr.msk.bf16.gmra.mrb[8].mxu0 %vm1606_vm0, %v1575_v6  ;;  %v2126_v36 = vcombine.low %v1498_v52, %v1501_v0 }
  0xf7   : > { %1155 = vst.msk [vmem:[#allocation2 + $0x38] sm:$0xff] %vm1147_vm10, %v1114_v50  ;;  %1529 = vrot.lane.b32.xlu0 %v2828_v49, %s2266_s29 }
  0xf8   : > { %813 = vrot.lane.b32.xlu1 %v2826_v42, %s2262_s21  ;;  %v1182_v42 = vrot.slane %v1181_v60, 4 }
  0xf9   : > { %v1204_v57 = vpop.permute.xlu0 %1203 }
  0xfa   : > { %1246 = vst.msk [vmem:[#allocation2 + $0x30] sm:$0xff] %vm1239_vm11, %v1204_v57  ;;  %v1206_v34 = vpop.permute.xlu1 %1205  ;;  %v1187_v18 = vsel %vm2358_vm6, %v1182_v42, %v1186_v8 }
  0xfb   : > { %1247 = vst.msk [vmem:[#allocation2 + $0x38] sm:$0xff] %vm1239_vm11, %v1206_v34  ;;  %1531 = vrot.lane.b32.xlu0 %v2849_v41, %s2266_s29  ;;  %v2120_v63 = vcombine.low %v1177_v15, %v1187_v18 }
  0xfc   : > { %815 = vrot.lane.b32.xlu1 %v2852_v47, %s2262_s21 }
  0xfd   : > { %v1280_v61 = vpop.permute.xlu0 %1279 }
  0xfe   : > { %1322 = vst.msk [vmem:[#allocation2 + $0x30] sm:$0xff] %vm1315_vm12, %v1280_v61  ;;  %v1282_v2 = vpop.permute.xlu1 %1281 }
  0xff   : > { %1323 = vst.msk [vmem:[#allocation2 + $0x38] sm:$0xff] %vm1315_vm12, %v1282_v2  ;;  %1057 = vrot.lane.b32.xlu0 %v2828_v49, %s2261_s20  ;;  %v1414_v49 = vrot.slane %v1412_v46, 5 }
 0x100   : > { %1059 = vrot.lane.b32.xlu1 %v2849_v41, %s2261_s20 }
 0x101   : > { %v1350_v45 = vpop.permute.xlu0 %1349  ;;  %v1419_v30 = vor.u32 %v1418_v11, %v1414_v49  ;;  %v1415_v21 = vsel %vm2358_vm6, %v1410_v14, %v1414_v49 }
 0x102   : > { %1392 = vst.msk [vmem:[#allocation2 + $0x30] sm:$0xff] %vm1385_vm13, %v1350_v45  ;;  %v1352_v4 = vpop.permute.xlu1 %1351 }
 0x103   : > { %1393 = vst.msk [vmem:[#allocation2 + $0x38] sm:$0xff] %vm1385_vm13, %v1352_v4  ;;  %1127 = vrot.lane.b32.xlu0 %v2809_v43, %s2259_s18  ;;  %v2122_v43 = vcombine.low %v1260_v25, %v1263_v23  ;;  %v1420_v27 = vrot.slane %v1419_v30, 4 }
 0x104   : > { %1129 = vrot.lane.b32.xlu1 %v2119_v5, %s2259_s18 }
 0x105   : > { %v1442_v44 = vpop.permute.xlu0 %1441  ;;  %v1425_v62 = vsel %vm2358_vm6, %v1420_v27, %v1424_v35 }
 0x106   : > { %1484 = vst.msk [vmem:[#allocation2 + $0x30] sm:$0xff] %vm1477_vm14, %v1442_v44  ;;  %v1444_v12 = vpop.permute.xlu1 %1443 }
 0x107   : > { %1485 = vst.msk [vmem:[#allocation2 + $0x38] sm:$0xff] %vm1477_vm14, %v1444_v12  ;;  %1219 = vrot.lane.b32.xlu0 %v2852_v47, %s2263_s24  ;;  %v2123_v47 = vcombine.low %v3052_v38, %v3056_v58 }
 0x108   : > { %1221 = vrot.lane.b32.xlu1 %v2120_v63, %s2263_s24 }
 0x109   : > { %v1518_v40 = vpop.permute.xlu0 %1517 }
 0x10a   : > { %1560 = vst.msk [vmem:[#allocation2 + $0x30] sm:$0xff] %vm1553_vm15, %v1518_v40  ;;  %v802_v59 = vpop.permute.xlu1 %801 }
 0x10b   : > { %842 = vst.msk [vmem:[#allocation2 + $0x40] sm:$0xff] %vm833_vm8, %v802_v59  ;;  %1295 = vrot.lane.b32.xlu0 %v2849_v41, %s2260_s19  ;;  %v2124_v41 = vcombine.low %v1415_v21, %v1425_v62 }
 0x10c   : > { %1297 = vrot.lane.b32.xlu1 %v2122_v43, %s2260_s19 }
 0x10d   : > { %v1520_v53 = vpop.permute.xlu0 %1519 }
 0x10e   : > { %1561 = vst.msk [vmem:[#allocation2 + $0x38] sm:$0xff] %vm1553_vm15, %v1520_v53  ;;  %v804_v37 = vpop.permute.xlu1 %803 }
 0x10f   : > { %843 = vst.msk [vmem:[#allocation2 + $0x48] sm:$0xff] %vm833_vm8, %v804_v37  ;;  %1365 = vrot.lane.b32.xlu0 %v2119_v5, %s2264_s27 }
 0x110   : > { %1367 = vrot.lane.b32.xlu1 %v2123_v47, %s2264_s27 }
 0x111   : > { %v1046_v33 = vpop.permute.xlu0 %1045  ;;  %v1576_v29 = vld [vmem:[#allocation2 + $0x30] sm:$0xff] }
 0x112   : > { %1086 = vst.msk [vmem:[#allocation2 + $0x40] sm:$0xff] %vm1077_vm9, %v1046_v33  ;;  %v1048_v26 = vpop.permute.xlu1 %1047  ;;  %2186 = vmatprep.mubr.msk.bf16.mxu0 %vm1606_vm0, %v1576_v29 }
 0x113   : > { %1087 = vst.msk [vmem:[#allocation2 + $0x48] sm:$0xff] %vm1077_vm9, %v1048_v26  ;;  %1457 = vrot.lane.b32.xlu0 %v2120_v63, %s2265_s28 }
 0x114   : > { %1459 = vrot.lane.b32.xlu1 %v2124_v41, %s2265_s28 }
 0x115   : > { %v1116_v6 = vpop.permute.xlu0 %1115  ;;  %v1577_v22 = vld [vmem:[#allocation2 + $0x38] sm:$0xff] }
 0x116   : > { %1156 = vst.msk [vmem:[#allocation2 + $0x40] sm:$0xff] %vm1147_vm10, %v1116_v6  ;;  %v1118_v50 = vpop.permute.xlu1 %1117  ;;  %2187 = vmatmul.mubr.msk.bf16.gmra.mrb[12].mxu0 %vm1606_vm0, %v1577_v22 }
 0x117   : > { %1157 = vst.msk [vmem:[#allocation2 + $0x48] sm:$0xff] %vm1147_vm10, %v1118_v50  ;;  %1533 = vrot.lane.b32.xlu0 %v2122_v43, %s2266_s29 }
 0x118   : > { %1535 = vrot.lane.b32.xlu1 %v2126_v36, %s2266_s29 }
 0x119   : > { %v1208_v13 = vpop.permute.xlu0 %1207 }
 0x11a   : > { %1248 = vst.msk [vmem:[#allocation2 + $0x40] sm:$0xff] %vm1239_vm11, %v1208_v13  ;;  %v1210_v1 = vpop.permute.xlu1 %1209 }
 0x11b   : > { %1249 = vst.msk [vmem:[#allocation2 + $0x48] sm:$0xff] %vm1239_vm11, %v1210_v1 }
 0x11d   : > { %v1284_v60 = vpop.permute.xlu0 %1283 }
 0x11e   : > { %1324 = vst.msk [vmem:[#allocation2 + $0x40] sm:$0xff] %vm1315_vm12, %v1284_v60  ;;  %v1286_v39 = vpop.permute.xlu1 %1285 }
 0x11f   : > { %1325 = vst.msk [vmem:[#allocation2 + $0x48] sm:$0xff] %vm1315_vm12, %v1286_v39 }
 0x121   : > { %v1354_v57 = vpop.permute.xlu0 %1353 }
 0x122   : > { %1394 = vst.msk [vmem:[#allocation2 + $0x40] sm:$0xff] %vm1385_vm13, %v1354_v57  ;;  %v1356_v38 = vpop.permute.xlu1 %1355 }
 0x123   : > { %1395 = vst.msk [vmem:[#allocation2 + $0x48] sm:$0xff] %vm1385_vm13, %v1356_v38 }
 0x125   : > { %v1446_v34 = vpop.permute.xlu0 %1445 }
 0x126   : > { %1486 = vst.msk [vmem:[#allocation2 + $0x40] sm:$0xff] %vm1477_vm14, %v1446_v34  ;;  %v1448_v58 = vpop.permute.xlu1 %1447 }
 0x127   : > { %1487 = vst.msk [vmem:[#allocation2 + $0x48] sm:$0xff] %vm1477_vm14, %v1448_v58 }
 0x129   : > { %v1522_v48 = vpop.permute.xlu0 %1521 }
 0x12a   : > { %1562 = vst.msk [vmem:[#allocation2 + $0x40] sm:$0xff] %vm1553_vm15, %v1522_v48  ;;  %v806_v42 = vpop.permute.xlu1 %805 }
 0x12b   : > { %844 = vst.msk [vmem:[#allocation2 + $0x50] sm:$0xff] %vm833_vm8, %v806_v42 }
 0x12d   : > { %v1524_v8 = vpop.permute.xlu0 %1523 }
 0x12e   : > { %1563 = vst.msk [vmem:[#allocation2 + $0x48] sm:$0xff] %vm1553_vm15, %v1524_v8  ;;  %v808_v54 = vpop.permute.xlu1 %807 }
 0x12f   : > { %845 = vst.msk [vmem:[#allocation2 + $0x58] sm:$0xff] %vm833_vm8, %v808_v54 }
 0x131   : > { %v1050_v56 = vpop.permute.xlu0 %1049  ;;  %v1578_v61 = vld [vmem:[#allocation2 + $0x40] sm:$0xff] }
 0x132   : > { %1088 = vst.msk [vmem:[#allocation2 + $0x50] sm:$0xff] %vm1077_vm9, %v1050_v56  ;;  %v1052_v55 = vpop.permute.xlu1 %1051  ;;  %2190 = vmatprep.mubr.msk.bf16.mxu1 %vm1606_vm0, %v1578_v61 }
 0x133   : > { %1089 = vst.msk [vmem:[#allocation2 + $0x58] sm:$0xff] %vm1077_vm9, %v1052_v55 }
 0x135   : > { %v1120_v3 = vpop.permute.xlu0 %1119  ;;  %v1579_v46 = vld [vmem:[#allocation2 + $0x48] sm:$0xff] }
 0x136   : > { %1158 = vst.msk [vmem:[#allocation2 + $0x50] sm:$0xff] %vm1147_vm10, %v1120_v3  ;;  %v1122_v2 = vpop.permute.xlu1 %1121  ;;  %2191 = vmatmul.mubr.msk.bf16.vlgmr.msra.gmra.mrb[0].mxu1 %vm1606_vm0, %v1579_v46 }
 0x137   : > { %1159 = vst.msk [vmem:[#allocation2 + $0x58] sm:$0xff] %vm1147_vm10, %v1122_v2 }
 0x139   : > { %v1212_v5 = vpop.permute.xlu0 %1211 }
 0x13a   : > { %1250 = vst.msk [vmem:[#allocation2 + $0x50] sm:$0xff] %vm1239_vm11, %v1212_v5  ;;  %v1214_v15 = vpop.permute.xlu1 %1213 }
 0x13b   : > { %1251 = vst.msk [vmem:[#allocation2 + $0x58] sm:$0xff] %vm1239_vm11, %v1214_v15 }
 0x13d   : > { %v1288_v18 = vpop.permute.xlu0 %1287 }
 0x13e   : > { %1326 = vst.msk [vmem:[#allocation2 + $0x50] sm:$0xff] %vm1315_vm12, %v1288_v18  ;;  %v1290_v16 = vpop.permute.xlu1 %1289 }
 0x13f   : > { %1327 = vst.msk [vmem:[#allocation2 + $0x58] sm:$0xff] %vm1315_vm12, %v1290_v16 }
 0x141   : > { %v1358_v19 = vpop.permute.xlu0 %1357 }
 0x142   : > { %1396 = vst.msk [vmem:[#allocation2 + $0x50] sm:$0xff] %vm1385_vm13, %v1358_v19  ;;  %v1360_v9 = vpop.permute.xlu1 %1359 }
 0x143   : > { %1397 = vst.msk [vmem:[#allocation2 + $0x58] sm:$0xff] %vm1385_vm13, %v1360_v9 }
 0x145   : > { %v1450_v45 = vpop.permute.xlu0 %1449 }
 0x146   : > { %1488 = vst.msk [vmem:[#allocation2 + $0x50] sm:$0xff] %vm1477_vm14, %v1450_v45  ;;  %v1452_v20 = vpop.permute.xlu1 %1451 }
 0x147   : > { %1489 = vst.msk [vmem:[#allocation2 + $0x58] sm:$0xff] %vm1477_vm14, %v1452_v20 }
 0x149   : > { %v1526_v10 = vpop.permute.xlu0 %1525 }
 0x14a   : > { %1564 = vst.msk [vmem:[#allocation2 + $0x50] sm:$0xff] %vm1553_vm15, %v1526_v10  ;;  %v810_v49 = vpop.permute.xlu1 %809 }
 0x14b   : > { %846 = vst.msk [vmem:[#allocation2 + $0x60] sm:$0xff] %vm833_vm8, %v810_v49 }
 0x14d   : > { %v1528_v11 = vpop.permute.xlu0 %1527 }
 0x14e   : > { %1565 = vst.msk [vmem:[#allocation2 + $0x58] sm:$0xff] %vm1553_vm15, %v1528_v11  ;;  %v812_v4 = vpop.permute.xlu1 %811 }
 0x14f   : > { %847 = vst.msk [vmem:[#allocation2 + $0x68] sm:$0xff] %vm833_vm8, %v812_v4 }
 0x151   : > { %v1054_v32 = vpop.permute.xlu0 %1053  ;;  %v1580_v63 = vld [vmem:[#allocation2 + $0x50] sm:$0xff] }
 0x152   : > { %1090 = vst.msk [vmem:[#allocation2 + $0x60] sm:$0xff] %vm1077_vm9, %v1054_v32  ;;  %v1056_v24 = vpop.permute.xlu1 %1055  ;;  %2194 = vmatprep.mubr.msk.bf16.mxu1 %vm1606_vm0, %v1580_v63 }
 0x153   : > { %1091 = vst.msk [vmem:[#allocation2 + $0x68] sm:$0xff] %vm1077_vm9, %v1056_v24 }
 0x155   : > { %v1124_v44 = vpop.permute.xlu0 %1123  ;;  %v1581_v25 = vld [vmem:[#allocation2 + $0x58] sm:$0xff] }
 0x156   : > { %1160 = vst.msk [vmem:[#allocation2 + $0x60] sm:$0xff] %vm1147_vm10, %v1124_v44  ;;  %v1126_v23 = vpop.permute.xlu1 %1125  ;;  %2195 = vmatmul.mubr.msk.bf16.gmra.mrb[4].mxu1 %vm1606_vm0, %v1581_v25 }
 0x157   : > { %1161 = vst.msk [vmem:[#allocation2 + $0x68] sm:$0xff] %vm1147_vm10, %v1126_v23 }
 0x159   : > { %v1216_v30 = vpop.permute.xlu0 %1215 }
 0x15a   : > { %1252 = vst.msk [vmem:[#allocation2 + $0x60] sm:$0xff] %vm1239_vm11, %v1216_v30  ;;  %v1218_v51 = vpop.permute.xlu1 %1217 }
 0x15b   : > { %1253 = vst.msk [vmem:[#allocation2 + $0x68] sm:$0xff] %vm1239_vm11, %v1218_v51 }
 0x15d   : > { %v1292_v12 = vpop.permute.xlu0 %1291 }
 0x15e   : > { %1328 = vst.msk [vmem:[#allocation2 + $0x60] sm:$0xff] %vm1315_vm12, %v1292_v12  ;;  %v1294_v43 = vpop.permute.xlu1 %1293 }
 0x15f   : > { %1329 = vst.msk [vmem:[#allocation2 + $0x68] sm:$0xff] %vm1315_vm12, %v1294_v43 }
 0x161   : > { %v1362_v14 = vpop.permute.xlu0 %1361 }
 0x162   : > { %1398 = vst.msk [vmem:[#allocation2 + $0x60] sm:$0xff] %vm1385_vm13, %v1362_v14  ;;  %v1364_v40 = vpop.permute.xlu1 %1363 }
 0x163   : > { %1399 = vst.msk [vmem:[#allocation2 + $0x68] sm:$0xff] %vm1385_vm13, %v1364_v40 }
 0x165   : > { %v1454_v27 = vpop.permute.xlu0 %1453 }
 0x166   : > { %1490 = vst.msk [vmem:[#allocation2 + $0x60] sm:$0xff] %vm1477_vm14, %v1454_v27  ;;  %v1456_v35 = vpop.permute.xlu1 %1455 }
 0x167   : > { %1491 = vst.msk [vmem:[#allocation2 + $0x68] sm:$0xff] %vm1477_vm14, %v1456_v35 }
 0x169   : > { %v1530_v17 = vpop.permute.xlu0 %1529 }
 0x16a   : > { %1566 = vst.msk [vmem:[#allocation2 + $0x60] sm:$0xff] %vm1553_vm15, %v1530_v17  ;;  %v814_v59 = vpop.permute.xlu1 %813 }
 0x16b   : > { %848 = vst.msk [vmem:[#allocation2 + $0x70] sm:$0xff] %vm833_vm8, %v814_v59 }
 0x16d   : > { %v1532_v47 = vpop.permute.xlu0 %1531 }
 0x16e   : > { %1567 = vst.msk [vmem:[#allocation2 + $0x68] sm:$0xff] %vm1553_vm15, %v1532_v47  ;;  %v816_v21 = vpop.permute.xlu1 %815 }
 0x16f   : > { %849 = vst.msk [vmem:[#allocation2 + $0x78] sm:$0xff] %vm833_vm8, %v816_v21 }
 0x171   : > { %v1058_v53 = vpop.permute.xlu0 %1057  ;;  %v1582_v62 = vld [vmem:[#allocation2 + $0x60] sm:$0xff] }
 0x172   : > { %1092 = vst.msk [vmem:[#allocation2 + $0x70] sm:$0xff] %vm1077_vm9, %v1058_v53  ;;  %v1060_v28 = vpop.permute.xlu1 %1059  ;;  %2198 = vmatprep.mubr.msk.bf16.mxu1 %vm1606_vm0, %v1582_v62 }
 0x173   : > { %1093 = vst.msk [vmem:[#allocation2 + $0x78] sm:$0xff] %vm1077_vm9, %v1060_v28 }
 0x175   : > { %v1128_v7 = vpop.permute.xlu0 %1127  ;;  %v1583_v31 = vld [vmem:[#allocation2 + $0x68] sm:$0xff] }
 0x176   : > { %1162 = vst.msk [vmem:[#allocation2 + $0x70] sm:$0xff] %vm1147_vm10, %v1128_v7  ;;  %v1130_v37 = vpop.permute.xlu1 %1129  ;;  %2199 = vmatmul.mubr.msk.bf16.gmra.mrb[8].mxu1 %vm1606_vm0, %v1583_v31 }
 0x177   : > { %1163 = vst.msk [vmem:[#allocation2 + $0x78] sm:$0xff] %vm1147_vm10, %v1130_v37 }
 0x179   : > { %v1220_v41 = vpop.permute.xlu0 %1219 }
 0x17a   : > { %1254 = vst.msk [vmem:[#allocation2 + $0x70] sm:$0xff] %vm1239_vm11, %v1220_v41  ;;  %v1222_v33 = vpop.permute.xlu1 %1221 }
 0x17b   : > { %1255 = vst.msk [vmem:[#allocation2 + $0x78] sm:$0xff] %vm1239_vm11, %v1222_v33 }
 0x17d   : > { %v1296_v29 = vpop.permute.xlu0 %1295 }
 0x17e   : > { %1330 = vst.msk [vmem:[#allocation2 + $0x70] sm:$0xff] %vm1315_vm12, %v1296_v29  ;;  %v1298_v52 = vpop.permute.xlu1 %1297 }
 0x17f   : > { %1331 = vst.msk [vmem:[#allocation2 + $0x78] sm:$0xff] %vm1315_vm12, %v1298_v52 }
 0x181   : > { %v1366_v0 = vpop.permute.xlu0 %1365 }
 0x182   : > { %1400 = vst.msk [vmem:[#allocation2 + $0x70] sm:$0xff] %vm1385_vm13, %v1366_v0  ;;  %v1368_v26 = vpop.permute.xlu1 %1367 }
 0x183   : > { %1401 = vst.msk [vmem:[#allocation2 + $0x78] sm:$0xff] %vm1385_vm13, %v1368_v26 }
 0x185   : > { %v1458_v36 = vpop.permute.xlu0 %1457 }
 0x186   : > { %1492 = vst.msk [vmem:[#allocation2 + $0x70] sm:$0xff] %vm1477_vm14, %v1458_v36  ;;  %v1460_v6 = vpop.permute.xlu1 %1459 }
 0x187   : > { %1493 = vst.msk [vmem:[#allocation2 + $0x78] sm:$0xff] %vm1477_vm14, %v1460_v6 }
 0x189   : > { %v1534_v22 = vpop.permute.xlu0 %1533  ;;  %v2176_v50 = vpop.f32.mrb[0].mxu0 }
 0x18a   : > { %1568 = vst.msk [vmem:[#allocation2 + $0x70] sm:$0xff] %vm1553_vm15, %v1534_v22  ;;  %1930 = vst [vmem:[%s3193_s8 + $0x10] sm:$0xff] %v2176_v50  ;;  %v1536_v13 = vpop.permute.xlu1 %1535  ;;  %v1693_v1 = vpop.f32.mrb[1].mxu0  ;;  %v1860_v58 = vmul.f32 %v2176_v50, %v2176_v50 }
 0x18b   : > { %1569 = vst.msk [vmem:[#allocation2 + $0x78] sm:$0xff] %vm1553_vm15, %v1536_v13  ;;  %1928 = vst [vmem:[%s3193_s8] sm:$0xff] %v1693_v1  ;;  %v2177_v60 = vpop.f32.mrb[2].mxu0  ;;  %v1858_v57 = vmul.f32 %v1693_v1, %v1693_v1 }
 0x18c   : > { %1931 = vst [vmem:[%s3193_s8 + $0x18] sm:$0xff] %v2177_v60  ;;  %v1696_v39 = vpop.f32.mrb[3].mxu0  ;;  %v1861_v8 = vmul.f32 %v2177_v60, %v2177_v60 }
 0x18d   : > { %v1820_v38 = vadd.f32 %v1696_v39, %v1693_v1  ;;  %v1859_v34 = vmul.f32 %v1696_v39, %v1696_v39  ;;  %1929 = vst [vmem:[%s3193_s8 + $0x8] sm:$0xff] %v1696_v39 }
 0x18f   : > { %v1821_v48 = vadd.f32 %v2176_v50, %v1820_v38  ;;  %v1890_v42 = vadd.f32 %v1859_v34, %v1858_v57 }
 0x191   : > { %v1891_v54 = vadd.f32 %v1890_v42, %v1860_v58  ;;  %v1584_v56 = vld [vmem:[#allocation2 + $0x70] sm:$0xff]  ;;  %v1822_v61 = vadd.f32 %v2177_v60, %v1821_v48 }
 0x192   : > { %2202 = vmatprep.mubr.msk.bf16.mxu1 %vm1606_vm0, %v1584_v56  ;;  %v1585_v55 = vld [vmem:[#allocation2 + $0x78] sm:$0xff] }
 0x193   : > { %2203 = vmatmul.mubr.msk.bf16.gmra.mrb[12].mxu1 %vm1606_vm0, %v1585_v55  ;;  %v1892_v3 = vadd.f32 %v1891_v54, %v1861_v8 }
 0x1a9   : > { %v2180_v46 = vpop.f32.mrb[4].mxu0 }
 0x1aa   : > { %1934 = vst [vmem:[%s3193_s8 + $0x30] sm:$0xff] %v2180_v46  ;;  %v1709_v2 = vpop.f32.mrb[5].mxu0  ;;  %v1864_v20 = vmul.f32 %v2180_v46, %v2180_v46 }
 0x1ab   : > { %v1823_v5 = vadd.f32 %v1822_v61, %v1709_v2  ;;  %v1862_v15 = vmul.f32 %v1709_v2, %v1709_v2  ;;  %1932 = vst [vmem:[%s3193_s8 + $0x20] sm:$0xff] %v1709_v2  ;;  %v2181_v18 = vpop.f32.mrb[6].mxu0 }
 0x1ac   : > { %1935 = vst [vmem:[%s3193_s8 + $0x38] sm:$0xff] %v2181_v18  ;;  %v1712_v16 = vpop.f32.mrb[7].mxu0  ;;  %v1865_v11 = vmul.f32 %v2181_v18, %v2181_v18 }
 0x1ad   : > { %v1893_v19 = vadd.f32 %v1892_v3, %v1862_v15  ;;  %v1824_v9 = vadd.f32 %v1823_v5, %v1712_v16  ;;  %v1863_v45 = vmul.f32 %v1712_v16, %v1712_v16  ;;  %1933 = vst [vmem:[%s3193_s8 + $0x28] sm:$0xff] %v1712_v16 }
 0x1af   : > { %v1825_v10 = vadd.f32 %v2180_v46, %v1824_v9  ;;  %v1894_v49 = vadd.f32 %v1893_v19, %v1863_v45 }
 0x1b1   : > { %v1895_v4 = vadd.f32 %v1894_v49, %v1864_v20  ;;  %v1826_v32 = vadd.f32 %v2181_v18, %v1825_v10 }
 0x1b3   : > { %v1896_v63 = vadd.f32 %v1895_v4, %v1865_v11 }
 0x1c9   : > { %v2184_v24 = vpop.f32.mrb[8].mxu0 }
 0x1ca   : > { %1938 = vst [vmem:[%s3193_s8 + $0x50] sm:$0xff] %v2184_v24  ;;  %v1725_v44 = vpop.f32.mrb[9].mxu0  ;;  %v1868_v40 = vmul.f32 %v2184_v24, %v2184_v24 }
 0x1cb   : > { %v1827_v25 = vadd.f32 %v1826_v32, %v1725_v44  ;;  %v1866_v23 = vmul.f32 %v1725_v44, %v1725_v44  ;;  %1936 = vst [vmem:[%s3193_s8 + $0x40] sm:$0xff] %v1725_v44  ;;  %v2185_v30 = vpop.f32.mrb[10].mxu0 }
 0x1cc   : > { %1939 = vst [vmem:[%s3193_s8 + $0x58] sm:$0xff] %v2185_v30  ;;  %v1728_v51 = vpop.f32.mrb[11].mxu0  ;;  %v1869_v17 = vmul.f32 %v2185_v30, %v2185_v30 }
 0x1cd   : > { %v1897_v12 = vadd.f32 %v1896_v63, %v1866_v23  ;;  %v1828_v43 = vadd.f32 %v1827_v25, %v1728_v51  ;;  %v1867_v14 = vmul.f32 %v1728_v51, %v1728_v51  ;;  %1937 = vst [vmem:[%s3193_s8 + $0x48] sm:$0xff] %v1728_v51 }
 0x1cf   : > { %v1829_v27 = vadd.f32 %v2184_v24, %v1828_v43  ;;  %v1898_v35 = vadd.f32 %v1897_v12, %v1867_v14 }
 0x1d1   : > { %v1899_v59 = vadd.f32 %v1898_v35, %v1868_v40  ;;  %v1830_v47 = vadd.f32 %v2185_v30, %v1829_v27 }
 0x1d3   : > { %v1900_v21 = vadd.f32 %v1899_v59, %v1869_v17 }
 0x1e9   : > { %v2188_v53 = vpop.f32.mrb[12].mxu0 }
 0x1ea   : > { %1942 = vst [vmem:[%s3193_s8 + $0x70] sm:$0xff] %v2188_v53  ;;  %v1741_v62 = vpop.f32.mrb[13].mxu0  ;;  %v1872_v52 = vmul.f32 %v2188_v53, %v2188_v53 }
 0x1eb   : > { %v1831_v28 = vadd.f32 %v1830_v47, %v1741_v62  ;;  %v1870_v7 = vmul.f32 %v1741_v62, %v1741_v62  ;;  %1940 = vst [vmem:[%s3193_s8 + $0x60] sm:$0xff] %v1741_v62  ;;  %v2189_v31 = vpop.f32.mrb[14].mxu0 }
 0x1ec   : > { %1943 = vst [vmem:[%s3193_s8 + $0x78] sm:$0xff] %v2189_v31  ;;  %v1744_v37 = vpop.f32.mrb[15].mxu0  ;;  %v1873_v36 = vmul.f32 %v2189_v31, %v2189_v31 }
 0x1ed   : > { %v1901_v41 = vadd.f32 %v1900_v21, %v1870_v7  ;;  %v1832_v33 = vadd.f32 %v1831_v28, %v1744_v37  ;;  %v1871_v29 = vmul.f32 %v1744_v37, %v1744_v37  ;;  %1941 = vst [vmem:[%s3193_s8 + $0x68] sm:$0xff] %v1744_v37 }
 0x1ef   : > { %v1833_v0 = vadd.f32 %v2188_v53, %v1832_v33  ;;  %v1902_v26 = vadd.f32 %v1901_v41, %v1871_v29 }
 0x1f1   : > { %v1903_v6 = vadd.f32 %v1902_v26, %v1872_v52  ;;  %v1834_v22 = vadd.f32 %v2189_v31, %v1833_v0 }
 0x1f3   : > { %v1904_v50 = vadd.f32 %v1903_v6, %v1873_v36 }
 0x209   : > { %v2192_v13 = vpop.f32.mrb[0].mxu1 }
 0x20a   : > { %1946 = vst [vmem:[%s3193_s8 + $0x90] sm:$0xff] %v2192_v13  ;;  %v1757_v1 = vpop.f32.mrb[1].mxu1  ;;  %v1876_v42 = vmul.f32 %v2192_v13, %v2192_v13 }
 0x20b   : > { %v1835_v60 = vadd.f32 %v1834_v22, %v1757_v1  ;;  %v1874_v39 = vmul.f32 %v1757_v1, %v1757_v1  ;;  %1944 = vst [vmem:[%s3193_s8 + $0x80] sm:$0xff] %v1757_v1  ;;  %v2193_v57 = vpop.f32.mrb[2].mxu1 }
 0x20c   : > { %1947 = vst [vmem:[%s3193_s8 + $0x98] sm:$0xff] %v2193_v57  ;;  %v1760_v38 = vpop.f32.mrb[3].mxu1  ;;  %v1877_v56 = vmul.f32 %v2193_v57, %v2193_v57 }
 0x20d   : > { %v1905_v34 = vadd.f32 %v1904_v50, %v1874_v39  ;;  %v1836_v58 = vadd.f32 %v1835_v60, %v1760_v38  ;;  %v1875_v48 = vmul.f32 %v1760_v38, %v1760_v38  ;;  %1945 = vst [vmem:[%s3193_s8 + $0x88] sm:$0xff] %v1760_v38 }
 0x20f   : > { %v1837_v8 = vadd.f32 %v2192_v13, %v1836_v58  ;;  %v1906_v54 = vadd.f32 %v1905_v34, %v1875_v48 }
 0x211   : > { %v1907_v61 = vadd.f32 %v1906_v54, %v1876_v42  ;;  %v1838_v55 = vadd.f32 %v2193_v57, %v1837_v8 }
 0x213   : > { %v1908_v3 = vadd.f32 %v1907_v61, %v1877_v56 }
 0x229   : > { %v2196_v46 = vpop.f32.mrb[4].mxu1 }
 0x22a   : > { %1950 = vst [vmem:[%s3193_s8 + $0xb0] sm:$0xff] %v2196_v46  ;;  %v1773_v2 = vpop.f32.mrb[5].mxu1  ;;  %v1880_v20 = vmul.f32 %v2196_v46, %v2196_v46 }
 0x22b   : > { %v1839_v5 = vadd.f32 %v1838_v55, %v1773_v2  ;;  %v1878_v15 = vmul.f32 %v1773_v2, %v1773_v2  ;;  %1948 = vst [vmem:[%s3193_s8 + $0xa0] sm:$0xff] %v1773_v2  ;;  %v2197_v18 = vpop.f32.mrb[6].mxu1 }
 0x22c   : > { %1951 = vst [vmem:[%s3193_s8 + $0xb8] sm:$0xff] %v2197_v18  ;;  %v1776_v16 = vpop.f32.mrb[7].mxu1  ;;  %v1881_v11 = vmul.f32 %v2197_v18, %v2197_v18 }
 0x22d   : > { %v1909_v19 = vadd.f32 %v1908_v3, %v1878_v15  ;;  %v1840_v9 = vadd.f32 %v1839_v5, %v1776_v16  ;;  %v1879_v45 = vmul.f32 %v1776_v16, %v1776_v16  ;;  %1949 = vst [vmem:[%s3193_s8 + $0xa8] sm:$0xff] %v1776_v16 }
 0x22f   : > { %v1841_v10 = vadd.f32 %v2196_v46, %v1840_v9  ;;  %v1910_v49 = vadd.f32 %v1909_v19, %v1879_v45 }
 0x231   : > { %v1911_v4 = vadd.f32 %v1910_v49, %v1880_v20  ;;  %v1842_v32 = vadd.f32 %v2197_v18, %v1841_v10 }
 0x233   : > { %v1912_v63 = vadd.f32 %v1911_v4, %v1881_v11 }
 0x249   : > { %v2200_v24 = vpop.f32.mrb[8].mxu1 }
 0x24a   : > { %1954 = vst [vmem:[%s3193_s8 + $0xd0] sm:$0xff] %v2200_v24  ;;  %v1789_v44 = vpop.f32.mrb[9].mxu1  ;;  %v1884_v40 = vmul.f32 %v2200_v24, %v2200_v24 }
 0x24b   : > { %v1843_v25 = vadd.f32 %v1842_v32, %v1789_v44  ;;  %v1882_v23 = vmul.f32 %v1789_v44, %v1789_v44  ;;  %1952 = vst [vmem:[%s3193_s8 + $0xc0] sm:$0xff] %v1789_v44  ;;  %v2201_v30 = vpop.f32.mrb[10].mxu1 }
 0x24c   : > { %1955 = vst [vmem:[%s3193_s8 + $0xd8] sm:$0xff] %v2201_v30  ;;  %v1792_v51 = vpop.f32.mrb[11].mxu1  ;;  %v1885_v17 = vmul.f32 %v2201_v30, %v2201_v30 }
 0x24d   : > { %v1913_v12 = vadd.f32 %v1912_v63, %v1882_v23  ;;  %v1844_v43 = vadd.f32 %v1843_v25, %v1792_v51  ;;  %v1883_v14 = vmul.f32 %v1792_v51, %v1792_v51  ;;  %1953 = vst [vmem:[%s3193_s8 + $0xc8] sm:$0xff] %v1792_v51 }
 0x24f   : > { %v1845_v27 = vadd.f32 %v2200_v24, %v1844_v43  ;;  %v1914_v35 = vadd.f32 %v1913_v12, %v1883_v14 }
 0x251   : > { %v1915_v59 = vadd.f32 %v1914_v35, %v1884_v40  ;;  %v1846_v47 = vadd.f32 %v2201_v30, %v1845_v27 }
 0x253   : > { %v1916_v21 = vadd.f32 %v1915_v59, %v1885_v17 }
 0x266   : > { %v2204_v53 = vpop.f32.mrb[12].mxu1 }
 0x267   : > { %1958 = vst [vmem:[%s3193_s8 + $0xf0] sm:$0xff] %v2204_v53  ;;  %v1805_v62 = vpop.f32.mrb[13].mxu1  ;;  %v1888_v52 = vmul.f32 %v2204_v53, %v2204_v53 }
 0x268   : > { %v1847_v28 = vadd.f32 %v1846_v47, %v1805_v62  ;;  %v1886_v7 = vmul.f32 %v1805_v62, %v1805_v62  ;;  %1956 = vst [vmem:[%s3193_s8 + $0xe0] sm:$0xff] %v1805_v62  ;;  %v2205_v31 = vpop.f32.mrb[14].mxu1 }
 0x269   : > { %1959 = vst [vmem:[%s3193_s8 + $0xf8] sm:$0xff] %v2205_v31  ;;  %v1808_v37 = vpop.f32.mrb[15].mxu1  ;;  %v1889_v36 = vmul.f32 %v2205_v31, %v2205_v31 }
 0x26a   : > { %v1917_v41 = vadd.f32 %v1916_v21, %v1886_v7  ;;  %v1848_v33 = vadd.f32 %v1847_v28, %v1808_v37  ;;  %v1887_v29 = vmul.f32 %v1808_v37, %v1808_v37  ;;  %1957 = vst [vmem:[%s3193_s8 + $0xe8] sm:$0xff] %v1808_v37 }
 0x26c   : > { %v1849_v0 = vadd.f32 %v2204_v53, %v1848_v33  ;;  %v1918_v26 = vadd.f32 %v1917_v41, %v1887_v29 }
 0x26e   : > { %v1850_v6 = vadd.f32 %v2205_v31, %v1849_v0  ;;  %v1919_v22 = vadd.f32 %v1918_v26, %v1888_v52 }
 0x270   : > { %v1851_v50 = vrot.slane %v1850_v6, 4  ;;  %v1920_v13 = vadd.f32 %v1919_v22, %v1889_v36 }
 0x272   : > { %v1852_v1 = vadd.f32 %v1851_v50, %v1850_v6  ;;  %v1921_v60 = vrot.slane %v1920_v13, 4 }
 0x274   : > { %v1853_v39 = vrot.slane %v1852_v1, 2  ;;  %v1922_v57 = vadd.f32 %v1921_v60, %v1920_v13 }
 0x276   : > { %v1854_v38 = vadd.f32 %v1853_v39, %v1852_v1  ;;  %v1923_v34 = vrot.slane %v1922_v57, 2 }
 0x278   : > { %v1855_v58 = vrot.slane %v1854_v38, 1  ;;  %v1924_v48 = vadd.f32 %v1923_v34, %v1922_v57 }
 0x27a   : > { %v1856_v42 = vadd.f32 %v1855_v58, %v1854_v38  ;;  %v1925_v8 = vrot.slane %v1924_v48, 1 }
 0x27c   : > { %1857 = vst [vmem:[%s181_s14] sm:$0x1] %v1856_v42  ;;  %v1926_v54 = vadd.f32 %v1925_v8, %v1924_v48 }
 0x27e   : > { %1927 = vst [vmem:[%s181_s14 + $0x1] sm:$0x1] %v1926_v54 }
 0x27f PF: > { %s14_s12 = sadd.s32 1, %s2257_s12  }
 0x280   : > { %p11_p4 = scmp.ge.s32.totalorder %s14_s12, 4  }
 0x282   :  { %13 = sbr.rel (!%p11_p4) target bundleno = 1 (0x1), region = 70 }

</bundles_post_ra>
